<compile_context>
chip_gen: v5e
topology: v5e:2x2
jax: 0.10.0
libtpu: 0.0.40
codegen_flags: <defaults>
</compile_context>

<pallas_src>
import functools

import jax
import jax.numpy as jnp
from jax.experimental import pallas as pl
from jax.experimental.pallas import tpu as pltpu

ALPHA = 1.0
GAMMA = 2.0


def _round_up(x, m):
    return ((x + m - 1) // m) * m


def _pow_static(x, p):
    """x ** p using only VALU multiplies when p is a small non-negative int."""
    if float(p) == int(p) and 0 <= int(p) <= 8:
        p = int(p)
        if p == 0:
            return jnp.ones_like(x)
        out = x
        for _ in range(p - 1):
            out = out * x
        return out
    return x ** p  # non-integer exponent: EUP pow fallback


def _focal_loss_kernel(pred_ref, tgt_ref, out_ref, acc_ref, *,
                       n_rows, tile_n, alpha, gamma, inv_n):
    i = pl.program_id(0)

    @pl.when(i == 0)
    def _init():
        acc_ref[...] = jnp.zeros_like(acc_ref)

    logits = pred_ref[...].astype(jnp.float32)            # (tile_n, C)
    tgt = tgt_ref[...]                                     # (tile_n, 1) int32

    # log-sum-exp with the row max folded out; the max cancels in ce so the
    # target gather can act directly on the shifted logits (no float one-hot).
    m = jnp.max(logits, axis=-1, keepdims=True)            # (tile_n, 1)
    shifted = logits - m                                    # (tile_n, C)
    class_ids = jax.lax.broadcasted_iota(jnp.int32, shifted.shape, 1)
    tgt_shifted = jnp.sum(
        jnp.where(class_ids == tgt, shifted, 0.0), axis=-1, keepdims=True)
    lse = jnp.log(jnp.sum(jnp.exp(shifted), axis=-1, keepdims=True))
    ce = jnp.maximum(lse - tgt_shifted, 0.0)                # (tile_n, 1), >= 0

    pt = jnp.exp(-ce)
    one_minus_pt = 1.0 - pt
    focal = alpha * _pow_static(one_minus_pt, gamma) * ce   # (tile_n, 1)

    # mask rows past the true N (ragged final tile).
    row = i * tile_n + jax.lax.broadcasted_iota(jnp.int32, focal.shape, 0)
    focal = jnp.where(row < n_rows, focal, 0.0)

    acc_ref[...] += jnp.sum(focal).reshape(1, 1)

    @pl.when(i == pl.num_programs(0) - 1)
    def _finalize():
        out_ref[...] = acc_ref[...] * inv_n                 # mean via multiply


def _choose_tile_n(n, c, itemsize):
    # Keep one (tile_n, C) logits buffer around ~2 MiB so the double-buffered
    # inputs stay far inside even v5e's 16 MiB default scoped VMEM (and well
    # under v7x's 64 MiB physical VMEM).
    budget_bytes = 2 * 1024 * 1024
    tile = budget_bytes // max(1, c * itemsize)
    tile = max(8, min(1024, tile))
    tile = min(tile, _round_up(n, 8))
    return _round_up(tile, 8)


def focal_loss(pred, target, *, alpha=ALPHA, gamma=GAMMA, tile_n=None):
    """pred: (N, C) float logits, target: (N,) int class indices -> scalar."""
    n, c = pred.shape
    tgt2d = target.astype(jnp.int32).reshape(n, 1)

    if tile_n is None:
        tile_n = _choose_tile_n(n, c, pred.dtype.itemsize)
    tile_n = _round_up(min(tile_n, _round_up(n, 8)), 8)
    grid = (pl.cdiv(n, tile_n),)

    kernel = functools.partial(
        _focal_loss_kernel,
        n_rows=n, tile_n=tile_n,
        alpha=float(alpha), gamma=float(gamma), inv_n=1.0 / float(n))

    cost = pl.CostEstimate(
        flops=8 * n * c,
        transcendentals=n * c + 2 * n,
        bytes_accessed=n * c * pred.dtype.itemsize + n * 4 + 4)

    out = pl.pallas_call(
        kernel,
        out_shape=jax.ShapeDtypeStruct((1, 1), jnp.float32),
        grid=grid,
        in_specs=[
            pl.BlockSpec((tile_n, c), lambda i: (i, 0)),   # native dtype logits
            pl.BlockSpec((tile_n, 1), lambda i: (i, 0)),   # int32 targets
        ],
        out_specs=pl.BlockSpec((1, 1), lambda i: (0, 0)),
        scratch_shapes=[pltpu.VMEM((1, 1), jnp.float32)],
        compiler_params=pltpu.CompilerParams(
            dimension_semantics=("arbitrary",),            # resident accumulator
            vmem_limit_bytes=32 * 1024 * 1024),
        cost_estimate=cost,
    )(pred, tgt2d)
    return out[0, 0]


def _reference(pred, target, alpha=ALPHA, gamma=GAMMA):
    # pure-JAX reference matching torch F.cross_entropy(reduction='none')
    logp = jax.nn.log_softmax(pred.astype(jnp.float32), axis=-1)
    ce = -jnp.take_along_axis(logp, target[:, None].astype(jnp.int32), axis=-1)[:, 0]
    pt = jnp.exp(-ce)
    return jnp.mean(alpha * (1.0 - pt) ** gamma * ce)


if __name__ == "__main__":
    key = jax.random.PRNGKey(0)
    k1, k2 = jax.random.split(key)

    # small detection-head-like logits; N deliberately not a multiple of the
    # tile so the ragged-tile masking path is exercised.
    N, C = 300, 16
    pred = jax.random.normal(k1, (N, C), dtype=jnp.float32)
    target = jax.random.randint(k2, (N,), 0, C, dtype=jnp.int32)

    ref = _reference(pred, target)

    # auto-chosen tile (single grid step at this size)
    loss = focal_loss(pred, target)
    jax.block_until_ready(loss)
    assert jnp.allclose(loss, ref, atol=1e-5, rtol=1e-5), (loss, ref)

    # forced multi-tile path (grid > 1, partial last tile masked)
    loss_tiled = focal_loss(pred, target, tile_n=128)
    jax.block_until_ready(loss_tiled)
    assert jnp.allclose(loss_tiled, ref, atol=1e-5, rtol=1e-5), (loss_tiled, ref)

    print("KERNEL_OK")
</pallas_src>

<mosaic_0001>
module attributes {stable_mosaic.version = 11 : i64} {
  func.func @_focal_loss_kernel(%arg0: i32, %arg1: memref<304x16xf32, #tpu.memory_space<vmem>>, %arg2: memref<304x1xi32, #tpu.memory_space<vmem>>, %arg3: memref<1x1xf32, #tpu.memory_space<vmem>>, %arg4: memref<1x1xf32, #tpu.memory_space<vmem>>) attributes {dimension_semantics = [#tpu.dimension_semantics<arbitrary>], iteration_bounds = array<i64: 1>, scalar_prefetch = 0 : i64, scratch_operands = 1 : i64, tpu.core_type = #tpu.core_type<tc>, window_params = [{transform_indices = @transform_0, window_bounds = array<i64: 304, 16>}, {transform_indices = @transform_1, window_bounds = array<i64: 304, 1>}, {pipeline_mode = #tpu.pipeline_mode<synchronous>, transform_indices = @transform_2, window_bounds = array<i64: 1, 1>}]} {
    %c0_i32 = arith.constant 0 : i32
    %0 = arith.cmpi eq, %arg0, %c0_i32 : i32
    %1 = arith.extui %0 : i1 to i32
    %c0_i32_0 = arith.constant 0 : i32
    %2 = arith.cmpi ne, %1, %c0_i32_0 : i32
    scf.if %2 {
      %cst_19 = arith.constant 0.000000e+00 : f32
      %51 = vector.broadcast %cst_19 : f32 to vector<1x1xf32>
      %c0_20 = arith.constant 0 : index
      %c0_21 = arith.constant 0 : index
      %52 = vector.load %arg4[%c0_20, %c0_21] : memref<1x1xf32, #tpu.memory_space<vmem>>, vector<1x1xf32>
      tpu.vector_store %arg4[%c0_20, %c0_21], %51 {strides = array<i32>} : memref<1x1xf32, #tpu.memory_space<vmem>>, vector<1x1xf32>,
    } else {
    }
    %c0 = arith.constant 0 : index
    %c0_1 = arith.constant 0 : index
    %3 = vector.load %arg1[%c0, %c0_1] : memref<304x16xf32, #tpu.memory_space<vmem>>, vector<304x16xf32>
    %c0_2 = arith.constant 0 : index
    %c0_3 = arith.constant 0 : index
    %4 = vector.load %arg2[%c0_2, %c0_3] : memref<304x1xi32, #tpu.memory_space<vmem>>, vector<304x1xi32>
    %cst = arith.constant dense<0xFF800000> : vector<304xf32>
    %5 = vector.multi_reduction <maximumf>, %3, %cst [1] : vector<304x16xf32> to vector<304xf32>
    %6 = vector.shape_cast %5 : vector<304xf32> to vector<304x1xf32>
    %7 = vector.broadcast %6 : vector<304x1xf32> to vector<304x16xf32>
    %8 = arith.subf %3, %7 : vector<304x16xf32>
    %9 = tpu.iota {dimensions = array<i32: 1>} : vector<304x16xi32>
    %10 = vector.broadcast %4 : vector<304x1xi32> to vector<304x16xi32>
    %11 = arith.cmpi eq, %9, %10 : vector<304x16xi32>
    %cst_4 = arith.constant 0.000000e+00 : f32
    %12 = vector.broadcast %cst_4 : f32 to vector<304x16xf32>
    %13 = arith.select %11, %8, %12 : vector<304x16xi1>, vector<304x16xf32>
    %cst_5 = arith.constant dense<0.000000e+00> : vector<304xf32>
    %14 = vector.multi_reduction <add>, %13, %cst_5 [1] : vector<304x16xf32> to vector<304xf32>
    %15 = vector.shape_cast %14 : vector<304xf32> to vector<304x1xf32>
    %16 = math.exp %8 : vector<304x16xf32>
    %cst_6 = arith.constant dense<0.000000e+00> : vector<304xf32>
    %17 = vector.multi_reduction <add>, %16, %cst_6 [1] : vector<304x16xf32> to vector<304xf32>
    %18 = vector.shape_cast %17 : vector<304xf32> to vector<304x1xf32>
    %19 = math.log %18 : vector<304x1xf32>
    %20 = arith.subf %19, %15 : vector<304x1xf32>
    %cst_7 = arith.constant 0.000000e+00 : f32
    %21 = vector.broadcast %cst_7 : f32 to vector<304x1xf32>
    %22 = arith.maximumf %20, %21 : vector<304x1xf32>
    %cst_8 = arith.constant 0.000000e+00 : f32
    %23 = vector.broadcast %cst_8 : f32 to vector<304x1xf32>
    %24 = arith.subf %23, %22 : vector<304x1xf32>
    %25 = math.exp %24 : vector<304x1xf32>
    %cst_9 = arith.constant 1.000000e+00 : f32
    %26 = vector.broadcast %cst_9 : f32 to vector<304x1xf32>
    %27 = arith.subf %26, %25 : vector<304x1xf32>
    %28 = arith.mulf %27, %27 : vector<304x1xf32>
    %cst_10 = arith.constant 1.000000e+00 : f32
    %29 = vector.broadcast %cst_10 : f32 to vector<304x1xf32>
    %30 = arith.mulf %29, %28 : vector<304x1xf32>
    %31 = arith.mulf %30, %22 : vector<304x1xf32>
    %c304_i32 = arith.constant 304 : i32
    %32 = arith.muli %arg0, %c304_i32 : i32
    %33 = tpu.iota {dimensions = array<i32: 0>} : vector<304x1xi32>
    %34 = vector.broadcast %32 : i32 to vector<304x1xi32>
    %35 = arith.addi %34, %33 : vector<304x1xi32>
    %c300_i32 = arith.constant 300 : i32
    %36 = vector.broadcast %c300_i32 : i32 to vector<304x1xi32>
    %37 = arith.cmpi slt, %35, %36 : vector<304x1xi32>
    %cst_11 = arith.constant 0.000000e+00 : f32
    %38 = vector.broadcast %cst_11 : f32 to vector<304x1xf32>
    %39 = arith.select %37, %31, %38 : vector<304x1xi1>, vector<304x1xf32>
    %c0_12 = arith.constant 0 : index
    %c0_13 = arith.constant 0 : index
    %40 = vector.load %arg4[%c0_12, %c0_13] : memref<1x1xf32, #tpu.memory_space<vmem>>, vector<1x1xf32>
    %41 = vector.shape_cast %39 : vector<304x1xf32> to vector<1x304x1xf32>
    %cst_14 = arith.constant dense<0.000000e+00> : vector<1xf32>
    %42 = vector.multi_reduction <add>, %41, %cst_14 [1, 2] : vector<1x304x1xf32> to vector<1xf32>
    %43 = vector.shape_cast %42 : vector<1xf32> to vector<1x1x1xf32>
    %44 = vector.extract %43[0, 0, 0] : f32 from vector<1x1x1xf32>
    %45 = vector.broadcast %44 : f32 to vector<1x1xf32>
    %46 = arith.addf %40, %45 : vector<1x1xf32>
    %c0_15 = arith.constant 0 : index
    %c0_16 = arith.constant 0 : index
    %47 = vector.load %arg4[%c0_15, %c0_16] : memref<1x1xf32, #tpu.memory_space<vmem>>, vector<1x1xf32>
    tpu.vector_store %arg4[%c0_15, %c0_16], %46 {strides = array<i32>} : memref<1x1xf32, #tpu.memory_space<vmem>>, vector<1x1xf32>,
    %c0_i32_17 = arith.constant 0 : i32
    %48 = arith.cmpi eq, %arg0, %c0_i32_17 : i32
    %49 = arith.extui %48 : i1 to i32
    %c0_i32_18 = arith.constant 0 : i32
    %50 = arith.cmpi ne, %49, %c0_i32_18 : i32
    scf.if %50 {
      %c0_19 = arith.constant 0 : index
      %c0_20 = arith.constant 0 : index
      %51 = vector.load %arg4[%c0_19, %c0_20] : memref<1x1xf32, #tpu.memory_space<vmem>>, vector<1x1xf32>
      %cst_21 = arith.constant 0.00333333341 : f32
      %52 = vector.broadcast %cst_21 : f32 to vector<1x1xf32>
      %53 = arith.mulf %51, %52 : vector<1x1xf32>
      %c0_22 = arith.constant 0 : index
      %c0_23 = arith.constant 0 : index
      %54 = vector.load %arg3[%c0_22, %c0_23] : memref<1x1xf32, #tpu.memory_space<vmem>>, vector<1x1xf32>
      tpu.vector_store %arg3[%c0_22, %c0_23], %53 {strides = array<i32>} : memref<1x1xf32, #tpu.memory_space<vmem>>, vector<1x1xf32>,
    } else {
    }
    return
  }
  func.func @transform_0(%arg0: i32) -> (i32, i32) {
    %c0_i32 = arith.constant 0 : i32
    %c0_i32_0 = arith.constant 0 : i32
    return %arg0, %c0_i32 : i32, i32
  }
  func.func @transform_1(%arg0: i32) -> (i32, i32) {
    %c0_i32 = arith.constant 0 : i32
    %c0_i32_0 = arith.constant 0 : i32
    return %arg0, %c0_i32 : i32, i32
  }
  func.func @transform_2(%arg0: i32) -> (i32, i32) {
    %c0_i32 = arith.constant 0 : i32
    %c0_i32_0 = arith.constant 0 : i32
    %c0_i32_1 = arith.constant 0 : i32
    return %c0_i32, %c0_i32_0 : i32, i32
  }
}

</mosaic_0001>

<bundles_post_ra>
// kernel: tpu_custom_call.1
= control target key start
LH: loop header
LB: loop body
LE: loop exit
PB: predicated region body
PF: predicated region fallthrough
CT: control target
= control target key end

     0   :  { %vm94_vm0 = vcmask 130048   ;;  %s2593_s0 = inlined_call_operand.vmem [shape: f32[300,16], index: 0, kind: input, shape index: {}]   ;;  %s2594_s1 = inlined_call_operand.vmem [shape: s32[300,1], index: 1, kind: input, shape index: {}]   ;;  %s2595_s2 = inlined_call_operand.hbm [shape: f32[1,1], index: 2, kind: output, shape index: {}]  }
   0x1   :  { %v1691_v0 = vld [vmem:[%s2593_s0 + $0x20] sm:$0xff]  ;;  %v1696_v1 = vld [vmem:[%s2593_s0 + $0x10] sm:$0xff]  ;;  %v1712_v6 = vld [vmem:[%s2593_s0 + $0x28] sm:$0xff] }
   0x2   :  { %v1701_v2 = vld [vmem:[%s2593_s0] sm:$0xff]  ;;  %v107_v3 = vsel %vm94_vm0, %v1691_v0, -inf  ;;  %v101_v4 = vsel %vm94_vm0, %v1696_v1, -inf  ;;  %v1717_v7 = vld [vmem:[%s2593_s0 + $0x18] sm:$0xff]  ;;  %v1722_v8 = vld [vmem:[%s2593_s0 + $0x8] sm:$0xff] }
   0x3   :  { %v95_v5 = vsel %vm94_vm0, %v1701_v2, -inf  ;;  %108 = vmax.xlane.f32.xlu2 %v107_v3  ;;  %102 = vmax.xlane.f32.xlu1 %v101_v4 }
   0x4   :  { %96 = vmax.xlane.f32.xlu0 %v95_v5 }
   0x5   :  { %7 = vsyncpa [#allocation4], 0  ;;  %v110_v9 = vsel %vm94_vm0, %v1712_v6, -inf  ;;  %v104_v10 = vsel %vm94_vm0, %v1717_v7, -inf  ;;  %v98_v11 = vsel %vm94_vm0, %v1722_v8, -inf  ;;  %v1733_v12 = vld [vmem:[%s2593_s0 + $0x40] sm:$0xff] }
   0x6   :  { %v1738_v13 = vld [vmem:[%s2593_s0 + $0x38] sm:$0xff]  ;;  %v1743_v14 = vld [vmem:[%s2593_s0 + $0x30] sm:$0xff]  ;;  %v119_v15 = vsel %vm94_vm0, %v1733_v12, -inf  ;;  %v1764_v20 = vld [vmem:[%s2593_s0 + $0x48] sm:$0xff]  ;;  %v1670_v56 = vmov 0   ;;  %s1672_s27 = smov [#allocation3]  }
   0x7   :  { %v116_v16 = vsel %vm94_vm0, %v1738_v13, -inf  ;;  %v113_v17 = vsel %vm94_vm0, %v1743_v14, -inf  ;;  %v1754_v18 = vld [vmem:[%s2593_s0 + $0x58] sm:$0xff]  ;;  %v1759_v19 = vld [vmem:[%s2593_s0 + $0x50] sm:$0xff]  ;;  %v122_v23 = vsel %vm94_vm0, %v1764_v20, -inf  ;;  %v1780_v25 = vld [vmem:[%s2593_s0 + $0x68] sm:$0xff]  ;;  %1395 = vset.pattern.permute.xlu2 %v1670_v56  ;;  %1396 = vset.pattern.permute.xlu0 %v1670_v56 }
   0x8   :  { %v128_v21 = vsel %vm94_vm0, %v1754_v18, -inf  ;;  %v125_v22 = vsel %vm94_vm0, %v1759_v19, -inf  ;;  %v1775_v24 = vld [vmem:[%s2593_s0 + $0x70] sm:$0xff]  ;;  %v1785_v26 = vld [vmem:[%s2593_s0 + $0x60] sm:$0xff]  ;;  %v134_v28 = vsel %vm94_vm0, %v1780_v25, -inf  ;;  %v1796_v30 = vld [vmem:[%s2593_s0 + $0x88] sm:$0xff]  ;;  %1397 = vset.pattern.permute.xlu1 %v1670_v56 }
   0x9   :  { %v137_v27 = vsel %vm94_vm0, %v1775_v24, -inf  ;;  %v131_v29 = vsel %vm94_vm0, %v1785_v26, -inf  ;;  %v1801_v31 = vld [vmem:[%s2593_s0 + $0x80] sm:$0xff]  ;;  %v1806_v32 = vld [vmem:[%s2593_s0 + $0x78] sm:$0xff]  ;;  %v146_v33 = vsel %vm94_vm0, %v1796_v30, -inf  ;;  %v1825_v38 = vld [vmem:[%s2593_s0 + $0x90] sm:$0xff] }
   0xa   :  { %v143_v34 = vsel %vm94_vm0, %v1801_v31, -inf  ;;  %v140_v35 = vsel %vm94_vm0, %v1806_v32, -inf  ;;  %v38_v36 = vld [vmem:[%s2593_s0 + $0xa0] sm:$0xff]  ;;  %v1820_v37 = vld [vmem:[%s2593_s0 + $0x98] sm:$0xff]  ;;  %v149_v41 = vsel %vm94_vm0, %v1825_v38, -inf  ;;  %v40_v43 = vld [vmem:[%s2593_s0 + $0xb0] sm:$0xff] }
   0xb   :  { %111 = vmax.xlane.f32.xlu2 %v110_v9  ;;  %105 = vmax.xlane.f32.xlu1 %v104_v10  ;;  %v155_v39 = vsel %vm94_vm0, %v38_v36, -inf  ;;  %v152_v40 = vsel %vm94_vm0, %v1820_v37, -inf  ;;  %v41_v42 = vld [vmem:[%s2593_s0 + $0xb8] sm:$0xff]  ;;  %v39_v44 = vld [vmem:[%s2593_s0 + $0xa8] sm:$0xff]  ;;  %v161_v46 = vsel %vm94_vm0, %v40_v43, -inf  ;;  %v44_v48 = vld [vmem:[%s2593_s0 + $0xd0] sm:$0xff] }
   0xc   :  { %99 = vmax.xlane.f32.xlu0 %v98_v11  ;;  %v164_v45 = vsel %vm94_vm0, %v41_v42, -inf  ;;  %v158_v47 = vsel %vm94_vm0, %v39_v44, -inf  ;;  %v43_v49 = vld [vmem:[%s2593_s0 + $0xc8] sm:$0xff]  ;;  %v42_v50 = vld [vmem:[%s2593_s0 + $0xc0] sm:$0xff]  ;;  %v173_v51 = vsel %vm94_vm0, %v44_v48, -inf  ;;  %v45_v57 = vld [vmem:[%s2593_s0 + $0xd8] sm:$0xff] }
   0xd   :  { %v170_v52 = vsel %vm94_vm0, %v43_v49, -inf  ;;  %v167_v53 = vsel %vm94_vm0, %v42_v50, -inf  ;;  %v47_v54 = vld [vmem:[%s2593_s0 + $0xe8] sm:$0xff]  ;;  %v46_v55 = vld [vmem:[%s2593_s0 + $0xe0] sm:$0xff]  ;;  %v176_v60 = vsel %vm94_vm0, %v45_v57, -inf  ;;  %v49_v62 = vld [vmem:[%s2593_s0 + $0xf8] sm:$0xff] }
   0xe   :  { %v182_v58 = vsel %vm94_vm0, %v47_v54, -inf  ;;  %v179_v59 = vsel %vm94_vm0, %v46_v55, -inf  ;;  %v50_v61 = vld [vmem:[%s2593_s0 + $0x100] sm:$0xff]  ;;  %v48_v63 = vld [vmem:[%s2593_s0 + $0xf0] sm:$0xff]  ;;  %v188_v4 = vsel %vm94_vm0, %v49_v62, -inf  ;;  %v53_v9 = vld [vmem:[%s2593_s0 + $0x118] sm:$0xff] }
   0xf   :  { %v191_v3 = vsel %vm94_vm0, %v50_v61, -inf  ;;  %v185_v5 = vsel %vm94_vm0, %v48_v63, -inf  ;;  %v52_v10 = vld [vmem:[%s2593_s0 + $0x110] sm:$0xff]  ;;  %v51_v11 = vld [vmem:[%s2593_s0 + $0x108] sm:$0xff]  ;;  %v59_v36 = vld [vmem:[%s2594_s1 + $0x18] sm:$0xff]  ;;  %s1379_s28 = sshll.u32 %s1672_s27, 4  ;;  %s1380_s28 = int_to_ptr.vmem [resolvable:$true] %s1379_s28 }
  0x10   :  { %v60_v44 = vld [vmem:[%s2594_s1 + $0x20] sm:$0xff]  ;;  %v62_v50 = vld [vmem:[%s2594_s1 + $0x30] sm:$0xff]  ;;  %v65_v56 = vld [vmem:[%s2594_s1 + $0x48] sm:$0xff]  ;;  %s1381_s3 = sshll.u32 %s2595_s2, 4  ;;  %s1382_s3 = int_to_ptr.hbm [resolvable:$true] %s1381_s3 }
  0x11   :  { %v66_v57 = vld [vmem:[%s2594_s1 + $0x50] sm:$0xff]  ;;  %v68_v61 = vld [vmem:[%s2594_s1 + $0x60] sm:$0xff]  ;;  %v69_v62 = vld [vmem:[%s2594_s1 + $0x68] sm:$0xff] }
  0x13   :  { %120 = vmax.xlane.f32.xlu2 %v119_v15  ;;  %117 = vmax.xlane.f32.xlu1 %v116_v16  ;;  %v200_v15 = vsel %vm94_vm0, %v53_v9, -inf  ;;  %v197_v16 = vsel %vm94_vm0, %v52_v10, -inf }
  0x14   :  { %114 = vmax.xlane.f32.xlu0 %v113_v17  ;;  %v194_v17 = vsel %vm94_vm0, %v51_v11, -inf }
  0x1b   :  { %129 = vmax.xlane.f32.xlu2 %v128_v21  ;;  %126 = vmax.xlane.f32.xlu1 %v125_v22  ;;  %v55_v21 = vld [vmem:[%s2593_s0 + $0x128] sm:$0xff]  ;;  %v54_v22 = vld [vmem:[%s2593_s0 + $0x120] sm:$0xff] }
  0x1c   :  { %123 = vmax.xlane.f32.xlu0 %v122_v23  ;;  %v206_v23 = vsel %vm94_vm0, %v55_v21, -inf }
  0x23   :  { %138 = vmax.xlane.f32.xlu2 %v137_v27  ;;  %135 = vmax.xlane.f32.xlu1 %v134_v28  ;;  %v203_v27 = vsel %vm94_vm0, %v54_v22, -inf  ;;  %v56_v28 = vld [vmem:[%s2594_s1] sm:$0xff] }
  0x24   :  { %132 = vmax.xlane.f32.xlu0 %v131_v29  ;;  %v57_v29 = vld [vmem:[%s2594_s1 + $0x8] sm:$0xff] }
  0x2b   :  { %147 = vmax.xlane.f32.xlu2 %v146_v33  ;;  %144 = vmax.xlane.f32.xlu1 %v143_v34 }
  0x2c   :  { %141 = vmax.xlane.f32.xlu0 %v140_v35 }
  0x33   :  { %156 = vmax.xlane.f32.xlu2 %v155_v39  ;;  %153 = vmax.xlane.f32.xlu1 %v152_v40  ;;  %v58_v39 = vld [vmem:[%s2594_s1 + $0x10] sm:$0xff]  ;;  %v64_v40 = vld [vmem:[%s2594_s1 + $0x40] sm:$0xff] }
  0x34   :  { %150 = vmax.xlane.f32.xlu0 %v149_v41 }
  0x3b   :  { %165 = vmax.xlane.f32.xlu2 %v164_v45  ;;  %162 = vmax.xlane.f32.xlu1 %v161_v46  ;;  %v61_v45 = vld [vmem:[%s2594_s1 + $0x28] sm:$0xff]  ;;  %v67_v46 = vld [vmem:[%s2594_s1 + $0x58] sm:$0xff] }
  0x3c   :  { %159 = vmax.xlane.f32.xlu0 %v158_v47 }
  0x43   :  { %174 = vmax.xlane.f32.xlu2 %v173_v51  ;;  %171 = vmax.xlane.f32.xlu1 %v170_v52  ;;  %v63_v51 = vld [vmem:[%s2594_s1 + $0x38] sm:$0xff]  ;;  %v70_v52 = vld [vmem:[%s2594_s1 + $0x70] sm:$0xff] }
  0x44   :  { %168 = vmax.xlane.f32.xlu0 %v167_v53 }
  0x4b   :  { %183 = vmax.xlane.f32.xlu2 %v182_v58  ;;  %180 = vmax.xlane.f32.xlu1 %v179_v59 }
  0x4c   :  { %177 = vmax.xlane.f32.xlu0 %v176_v60 }
  0x53   :  { %192 = vmax.xlane.f32.xlu2 %v191_v3  ;;  %189 = vmax.xlane.f32.xlu1 %v188_v4 }
  0x54   :  { %186 = vmax.xlane.f32.xlu0 %v185_v5 }
  0x5b   :  { %201 = vmax.xlane.f32.xlu2 %v200_v15  ;;  %198 = vmax.xlane.f32.xlu1 %v197_v16 }
  0x5c   :  { %195 = vmax.xlane.f32.xlu0 %v194_v17 }
  0x63   :  { %207 = vmax.xlane.f32.xlu1 %v206_v23 }
  0x64   :  { %204 = vmax.xlane.f32.xlu0 %v203_v27 }
  0x73   :  { %250 = vperm.xlu2 %1395, %v56_v28  }
  0x76   :  { %v109_v33 = vpop.xlane.xlu2 %108  ;;  %v103_v34 = vpop.xlane.xlu1 %102 }
  0x77   :  { %v97_v35 = vpop.xlane.xlu0 %96  ;;  %v1981_v21 = vsub.f32 %v1691_v0, %v109_v33  ;;  %v1988_v27 = vsub.f32 %v1696_v1, %v103_v34 }
  0x78   :  { %253 = vperm.xlu0 %1396, %v57_v29   ;;  %v209_v10 = vsub.f32 %v1701_v2, %v97_v35 }
  0x79   :  { %v561_v23 = vmul.f32 1.442695, %v1981_v21  ;;  %v557_v0 = vmul.f32 1.442695, %v1988_v27 }
  0x7a   :  { %v553_v15 = vmul.f32 1.442695, %v209_v10 }
  0x7b   :  { %259 = vperm.xlu2 %1395, %v59_v36  }
  0x7c   :  { %256 = vperm.xlu1 %1397, %v58_v39   ;;  %1398 = vpow2.f32 %v553_v15 }
  0x7d   :  { %1400 = vpow2.f32 %v561_v23 }
  0x7e   :  { %v112_v41 = vpop.xlane.xlu2 %111  ;;  %v106_v42 = vpop.xlane.xlu1 %105 }
  0x7f   :  { %v100_v43 = vpop.xlane.xlu0 %99  ;;  %v212_v36 = vsub.f32 %v1717_v7, %v106_v42  ;;  %v2001_v1 = vsub.f32 %v1712_v6, %v112_v41 }
  0x80   :  { %274 = vperm.xlu0 %1396, %v64_v40   ;;  %v1984_v22 = vsub.f32 %v1722_v8, %v100_v43 }
  0x81   :  { %v559_v39 = vmul.f32 1.442695, %v212_v36 }
  0x82   :  { %v1399_v28 = vpop.eup %1398  ;;  %v555_v29 = vmul.f32 1.442695, %v1984_v22 }
  0x83   :  { %262 = vperm.xlu2 %1395, %v60_v44   ;;  %v629_v8 = vsel %vm94_vm0, %v1399_v28, 0.0  ;;  %v1401_v34 = vpop.eup %1400 }
  0x84   :  { %265 = vperm.xlu1 %1397, %v61_v45   ;;  %1402 = vpow2.f32 %v555_v29  ;;  %v563_v45 = vmul.f32 1.442695, %v2001_v1 }
  0x85   :  { %1404 = vpow2.f32 %v557_v0 }
  0x86   :  { %v1924_v47 = vpop.xlane.xlu2 %120  ;;  %v1926_v48 = vpop.xlane.xlu1 %117  ;;  %1406 = vpow2.f32 %v559_v39 }
  0x87   :  { %v1928_v49 = vpop.xlane.xlu0 %114  ;;  %1408 = vpow2.f32 %v563_v45 }
  0x88   :  { %283 = vperm.xlu0 %1396, %v67_v46   ;;  %v641_v46 = vsel %vm94_vm0, %v1401_v34, 0.0  ;;  %v215_v6 = vsub.f32 %v1743_v14, %v1928_v49  ;;  %v247_v49 = vlaneseq }
  0x8a   :  { %v1403_v44 = vpop.eup %1402  ;;  %v2028_v0 = vand.u32 127, %v247_v49 }
  0x8b   :  { %268 = vperm.xlu2 %1395, %v62_v50   ;;  %v1405_v50 = vpop.eup %1404  ;;  %v632_v42 = vsel %vm94_vm0, %v1403_v44, 0.0 }
  0x8c   :  { %271 = vperm.xlu1 %1397, %v63_v51   ;;  %v635_v41 = vsel %vm94_vm0, %v1405_v50, 0.0 }
  0x8e   :  { %v1939_v53 = vpop.xlane.xlu2 %129  ;;  %v1941_v54 = vpop.xlane.xlu1 %126 }
  0x8f   :  { %v1943_v55 = vpop.xlane.xlu0 %123 }
  0x90   :  { %292 = vperm.xlu0 %1396, %v70_v52   ;;  %v1407_v52 = vpop.eup %1406  ;;  %v2036_v44 = vsub.f32 %v1764_v20, %v1943_v55  ;;  %v2048_v20 = vsub.f32 %v1738_v13, %v1926_v48 }
  0x92   :  { %v571_v50 = vmul.f32 1.442695, %v2036_v44 }
  0x93   :  { %277 = vperm.xlu2 %1395, %v65_v56   ;;  %v565_v56 = vmul.f32 1.442695, %v215_v6 }
  0x94   :  { %280 = vperm.xlu1 %1397, %v66_v57  }
  0x95   :  { %1410 = vpow2.f32 %v565_v56 }
  0x96   :  { %v1951_v58 = vpop.xlane.xlu2 %138  ;;  %v1953_v59 = vpop.xlane.xlu1 %135  ;;  %1412 = vpow2.f32 %v571_v50 }
  0x97   :  { %v1955_v60 = vpop.xlane.xlu0 %132 }
  0x9b   :  { %286 = vperm.xlu2 %1395, %v68_v61   ;;  %v1409_v61 = vpop.eup %1408 }
  0x9c   :  { %289 = vperm.xlu1 %1397, %v69_v62   ;;  %v638_v62 = vsel %vm94_vm0, %v1407_v52, 0.0  ;;  %v644_v23 = vsel %vm94_vm0, %v1409_v61, 0.0  ;;  %v1411_v28 = vpop.eup %1410 }
  0x9d   :  { %v1413_v55 = vpop.eup %1412 }
  0x9e   :  { %v1963_v63 = vpop.xlane.xlu2 %147  ;;  %v1967_v4 = vpop.xlane.xlu1 %144 }
  0x9f   :  { %v1965_v3 = vpop.xlane.xlu0 %141 }
  0xa6   :  { %v1969_v5 = vpop.xlane.xlu2 %156  ;;  %v1974_v11 = vpop.xlane.xlu1 %153 }
  0xa7   :  { %v1971_v9 = vpop.xlane.xlu0 %150 }
  0xae   :  { %v1976_v16 = vpop.xlane.xlu2 %165  ;;  %v1990_v2 = vpop.xlane.xlu1 %162 }
  0xaf   :  { %v1978_v17 = vpop.xlane.xlu0 %159 }
  0xb6   :  { %v1993_v35 = vpop.xlane.xlu2 %174  ;;  %v2003_v40 = vpop.xlane.xlu1 %171 }
  0xb7   :  { %v1996_v33 = vpop.xlane.xlu0 %168 }
  0xba   :  { %630 = vadd.xlane.f32.xlu0 %v629_v8  ;;  %v647_v8 = vsel %vm94_vm0, %v1411_v28, 0.0  ;;  %v567_v28 = vmul.f32 1.442695, %v2048_v20 }
  0xbc   :  { %1414 = vpow2.f32 %v567_v28 }
  0xbe   :  { %v2005_v43 = vpop.xlane.xlu2 %183  ;;  %v2017_v57 = vpop.xlane.xlu1 %180 }
  0xbf   :  { %v2009_v7 = vpop.xlane.xlu0 %177 }
  0xc2   :  { %642 = vadd.xlane.f32.xlu0 %v641_v46 }
  0xc4   :  { %633 = vadd.xlane.f32.xlu2 %v632_v42 }
  0xc6   :  { %v2015_v51 = vpop.xlane.xlu2 %192  ;;  %636 = vadd.xlane.f32.xlu1 %v635_v41  ;;  %v2025_v29 = vpop.xlane.xlu1 %189 }
  0xc7   :  { %v2020_v15 = vpop.xlane.xlu0 %186 }
  0xcc   :  { %639 = vadd.xlane.f32.xlu2 %v638_v62 }
  0xce   :  { %v2023_v14 = vpop.xlane.xlu2 %201  ;;  %645 = vadd.xlane.f32.xlu1 %v644_v23  ;;  %v2040_v42 = vpop.xlane.xlu1 %198  ;;  %v2054_v23 = vsub.f32 %v1733_v12, %v1924_v47 }
  0xcf   :  { %v2031_v39 = vpop.xlane.xlu0 %195 }
  0xd0   :  { %v569_v13 = vmul.f32 1.442695, %v2054_v23 }
  0xd2   :  { %1416 = vpow2.f32 %v569_v13 }
  0xd6   :  { %v251_v34 = vpop.permute.xlu2 %250  ;;  %648 = vadd.xlane.f32.xlu1 %v647_v8  ;;  %v656_v8 = vsel %vm94_vm0, %v1413_v55, 0.0 }
  0xd7   :  { %vm363_vm1 = vcmp.eq.s32.totalorder %v2028_v0, %v251_v34  ;;  %v2043_v52 = vpop.xlane.xlu0 %204 }
  0xd8   :  { %v401_v45 = vsel %vm363_vm1, %v209_v10, 0.0  ;;  %v2050_v10 = vpop.xlane.xlu1 %207  ;;  %vm1279_vm1 = vcmask 7168  }
  0xd9   :  { %v439_v46 = vsel %vm94_vm0, %v401_v45, 0.0 }
  0xda   :  { %440 = vadd.xlane.f32.xlu2 %v439_v46 }
  0xde   :  { %v260_v41 = vpop.permute.xlu2 %259 }
  0xdf   :  { %vm366_vm2 = vcmp.eq.s32.totalorder %v2028_v0, %v260_v41 }
  0xe0   :  { %v404_v56 = vsel %vm366_vm2, %v212_v36, 0.0  ;;  %v2059_v36 = vsub.f32 %v1785_v26, %v1955_v60 }
  0xe1   :  { %v448_v61 = vsel %vm94_vm0, %v404_v56, 0.0  ;;  %v1415_v56 = vpop.eup %1414 }
  0xe2   :  { %449 = vadd.xlane.f32.xlu1 %v448_v61  ;;  %v577_v48 = vmul.f32 1.442695, %v2059_v36  ;;  %v1417_v61 = vpop.eup %1416  ;;  %v650_v55 = vsel %vm94_vm0, %v1415_v56, 0.0 }
  0xe4   :  { %1418 = vpow2.f32 %v577_v48 }
  0xe6   :  { %v263_v62 = vpop.permute.xlu2 %262 }
  0xe7   :  { %vm367_vm6 = vcmp.eq.s32.totalorder %v2028_v0, %v263_v62 }
  0xe8   :  { %v405_v48 = vsel %vm367_vm6, %v1981_v21, 0.0 }
  0xea   :  { %v254_v34 = vpop.permute.xlu0 %253  ;;  %657 = vadd.xlane.f32.xlu1 %v656_v8  ;;  %v1419_v28 = vpop.eup %1418  ;;  %v2085_v8 = vsub.f32 %v1806_v32, %v1965_v3 }
  0xeb   :  { %vm364_vm3 = vcmp.eq.s32.totalorder %v2028_v0, %v254_v34  ;;  %v665_v13 = vsel %vm94_vm0, %v1419_v28, 0.0 }
  0xec   :  { %v402_v12 = vsel %vm364_vm3, %v1984_v22, 0.0  ;;  %v2074_v22 = vsub.f32 %v1759_v19, %v1941_v54  ;;  %v653_v54 = vsel %vm94_vm0, %v1417_v61, 0.0  ;;  %v583_v32 = vmul.f32 1.442695, %v2085_v8 }
  0xed   :  { %v442_v47 = vsel %vm94_vm0, %v402_v12, 0.0 }
  0xee   :  { %443 = vadd.xlane.f32.xlu0 %v442_v47  ;;  %v269_v45 = vpop.permute.xlu2 %268  ;;  %v257_v46 = vpop.permute.xlu1 %256 }
  0xef   :  { %vm369_vm4 = vcmp.eq.s32.totalorder %v2028_v0, %v269_v45  ;;  %vm365_vm5 = vcmp.eq.s32.totalorder %v2028_v0, %v257_v46  ;;  %v2101_v45 = vsub.f32 %v1780_v25, %v1953_v59 }
  0xf0   :  { %v403_v26 = vsel %vm365_vm5, %v1988_v27, 0.0  ;;  %v407_v60 = vsel %vm369_vm4, %v215_v6, 0.0  ;;  %v2079_v27 = vsub.f32 %v1754_v18, %v1939_v53  ;;  %v573_v6 = vmul.f32 1.442695, %v2074_v22 }
  0xf1   :  { %v445_v50 = vsel %vm94_vm0, %v403_v26, 0.0  ;;  %v457_v41 = vsel %vm94_vm0, %v407_v60, 0.0  ;;  %v451_v53 = vsel %vm94_vm0, %v405_v48, 0.0 }
  0xf2   :  { %446 = vadd.xlane.f32.xlu2 %v445_v50  ;;  %458 = vadd.xlane.f32.xlu1 %v457_v41  ;;  %v575_v18 = vmul.f32 1.442695, %v2079_v27  ;;  %1420 = vpow2.f32 %v573_v6  ;;  %v579_v50 = vmul.f32 1.442695, %v2101_v45  ;;  %v2112_v41 = vsub.f32 %v1825_v38, %v1971_v9  ;;  %v275_v25 = vpop.permute.xlu0 %274 }
  0xf3   :  { %vm371_vm10 = vcmp.eq.s32.totalorder %v2028_v0, %v275_v25 }
  0xf4   :  { %1422 = vpow2.f32 %v575_v18  ;;  %v589_v38 = vmul.f32 1.442695, %v2112_v41  ;;  %v409_v28 = vsel %vm371_vm10, %v2054_v23, 0.0 }
  0xf5   :  { %1424 = vpow2.f32 %v583_v32 }
  0xf6   :  { %651 = vadd.xlane.f32.xlu0 %v650_v55  ;;  %v278_v34 = vpop.permute.xlu2 %277  ;;  %v266_v19 = vpop.permute.xlu1 %265  ;;  %1426 = vpow2.f32 %v579_v50 }
  0xf7   :  { %vm372_vm7 = vcmp.eq.s32.totalorder %v2028_v0, %v278_v34  ;;  %vm368_vm8 = vcmp.eq.s32.totalorder %v2028_v0, %v266_v19  ;;  %v463_v34 = vsel %vm94_vm0, %v409_v28, 0.0 }
  0xf8   :  { %v406_v3 = vsel %vm368_vm8, %v2001_v1, 0.0  ;;  %v410_v62 = vsel %vm372_vm7, %v2036_v44, 0.0  ;;  %v1421_v47 = vpop.eup %1420  ;;  %v2106_v44 = vsub.f32 %v1775_v24, %v1951_v58 }
  0xf9   :  { %v454_v21 = vsel %vm94_vm0, %v406_v3, 0.0  ;;  %v466_v12 = vsel %vm94_vm0, %v410_v62, 0.0  ;;  %v659_v60 = vsel %vm94_vm0, %v1421_v47, 0.0 }
  0xfa   :  { %654 = vadd.xlane.f32.xlu2 %v653_v54  ;;  %666 = vadd.xlane.f32.xlu1 %v665_v13  ;;  %v1423_v26 = vpop.eup %1422  ;;  %v581_v24 = vmul.f32 1.442695, %v2106_v44  ;;  %v2132_v54 = vsub.f32 %v1801_v31, %v1967_v4  ;;  %v284_v32 = vpop.permute.xlu0 %283 }
  0xfb   :  { %v1425_v1 = vpop.eup %1424  ;;  %v662_v56 = vsel %vm94_vm0, %v1423_v26, 0.0  ;;  %vm374_vm13 = vcmp.eq.s32.totalorder %v2028_v0, %v284_v32 }
  0xfc   :  { %v674_v61 = vsel %vm94_vm0, %v1425_v1, 0.0  ;;  %1428 = vpow2.f32 %v581_v24  ;;  %v1427_v19 = vpop.eup %1426  ;;  %v585_v18 = vmul.f32 1.442695, %v2132_v54  ;;  %v412_v62 = vsel %vm374_vm13, %v2079_v27, 0.0 }
  0xfd   :  { %1430 = vpow2.f32 %v589_v38  ;;  %v668_v48 = vsel %vm94_vm0, %v1427_v19, 0.0 }
  0xfe   :  { %452 = vadd.xlane.f32.xlu0 %v451_v53  ;;  %v272_v46 = vpop.permute.xlu1 %271  ;;  %v287_v59 = vpop.permute.xlu2 %286 }
  0xff   :  { %vm370_vm9 = vcmp.eq.s32.totalorder %v2028_v0, %v272_v46  ;;  %vm375_vm11 = vcmp.eq.s32.totalorder %v2028_v0, %v287_v59 }
 0x100   :  { %v408_v55 = vsel %vm370_vm9, %v2048_v20, 0.0  ;;  %v413_v9 = vsel %vm375_vm11, %v2059_v36, 0.0  ;;  %v2126_v20 = vsub.f32 %v1820_v37, %v1974_v11  ;;  %v2139_v11 = vsub.f32 %v1796_v30, %v1963_v63 }
 0x101   :  { %v460_v58 = vsel %vm94_vm0, %v408_v55, 0.0  ;;  %v475_v6 = vsel %vm94_vm0, %v413_v9, 0.0  ;;  %v71_v55 = vld [vmem:[%s2594_s1 + $0x78] sm:$0xff] }
 0x102   :  { %455 = vadd.xlane.f32.xlu2 %v454_v21  ;;  %467 = vadd.xlane.f32.xlu1 %v466_v12  ;;  %v591_v36 = vmul.f32 1.442695, %v2126_v20  ;;  %v1429_v13 = vpop.eup %1428  ;;  %v587_v3 = vmul.f32 1.442695, %v2139_v11  ;;  %v472_v12 = vsel %vm94_vm0, %v412_v62, 0.0  ;;  %v293_v1 = vpop.permute.xlu0 %292 }
 0x103   :  { %v1431_v37 = vpop.eup %1430  ;;  %v671_v4 = vsel %vm94_vm0, %v1429_v13, 0.0  ;;  %vm377_vm15 = vcmp.eq.s32.totalorder %v2028_v0, %v293_v1 }
 0x104   :  { %1432 = vpow2.f32 %v591_v36  ;;  %v683_v31 = vsel %vm94_vm0, %v1431_v37, 0.0  ;;  %v415_v25 = vsel %vm377_vm15, %v2106_v44, 0.0  ;;  %v74_v44 = vld [vmem:[%s2594_s1 + $0x90] sm:$0xff]  ;;  %v76_v36 = vld [vmem:[%s2594_s1 + $0xa0] sm:$0xff] }
 0x105   :  { %1434 = vpow2.f32 %v585_v18  ;;  %v481_v59 = vsel %vm94_vm0, %v415_v25, 0.0 }
 0x106   :  { %660 = vadd.xlane.f32.xlu0 %v659_v60  ;;  %v281_v23 = vpop.permute.xlu1 %280  ;;  %1436 = vpow2.f32 %v587_v3 }
 0x107   :  { %vm373_vm12 = vcmp.eq.s32.totalorder %v2028_v0, %v281_v23  ;;  %v77_v23 = vld [vmem:[%s2594_s1 + $0xa8] sm:$0xff] }
 0x108   :  { %v411_v53 = vsel %vm373_vm12, %v2074_v22, 0.0 }
 0x109   :  { %v469_v30 = vsel %vm94_vm0, %v411_v53, 0.0 }
 0x10a   :  { %663 = vadd.xlane.f32.xlu2 %v662_v56  ;;  %675 = vadd.xlane.f32.xlu1 %v674_v61  ;;  %v1433_v63 = vpop.eup %1432 }
 0x10b   :  { %v686_v21 = vsel %vm94_vm0, %v1433_v63, 0.0  ;;  %v1435_v47 = vpop.eup %1434 }
 0x10c   :  { %v677_v46 = vsel %vm94_vm0, %v1435_v47, 0.0  ;;  %v1437_v26 = vpop.eup %1436  ;;  %v83_v47 = vld [vmem:[%s2594_s1 + $0xd8] sm:$0xff] }
 0x10d   :  { %v680_v60 = vsel %vm94_vm0, %v1437_v26, 0.0 }
 0x10e   :  { %461 = vadd.xlane.f32.xlu0 %v460_v58  ;;  %v290_v22 = vpop.permute.xlu1 %289  ;;  %v73_v58 = vld [vmem:[%s2594_s1 + $0x88] sm:$0xff] }
 0x10f   :  { %vm376_vm14 = vcmp.eq.s32.totalorder %v2028_v0, %v290_v22 }
 0x110   :  { %v414_v27 = vsel %vm376_vm14, %v2101_v45, 0.0 }
 0x111   :  { %v478_v50 = vsel %vm94_vm0, %v414_v27, 0.0 }
 0x112   :  { %476 = vadd.xlane.f32.xlu1 %v475_v6  ;;  %464 = vadd.xlane.f32.xlu2 %v463_v34 }
 0x116   :  { %669 = vadd.xlane.f32.xlu0 %v668_v48 }
 0x11a   :  { %684 = vadd.xlane.f32.xlu1 %v683_v31  ;;  %672 = vadd.xlane.f32.xlu2 %v671_v4  ;;  %v79_v31 = vld [vmem:[%s2594_s1 + $0xb8] sm:$0xff]  ;;  %v80_v4 = vld [vmem:[%s2594_s1 + $0xc0] sm:$0xff] }
 0x11e   :  { %470 = vadd.xlane.f32.xlu0 %v469_v30 }
 0x122   :  { %687 = vadd.xlane.f32.xlu1 %v686_v21  ;;  %473 = vadd.xlane.f32.xlu2 %v472_v12  ;;  %v82_v12 = vld [vmem:[%s2594_s1 + $0xd0] sm:$0xff] }
 0x126   :  { %678 = vadd.xlane.f32.xlu0 %v677_v46 }
 0x12a   :  { %681 = vadd.xlane.f32.xlu2 %v680_v60 }
 0x12d   :  { %v631_v24 = vpop.xlane.xlu0 %630 }
 0x12e   :  { %479 = vadd.xlane.f32.xlu0 %v478_v50  ;;  %1438 = vlog2.f32 %v631_v24 }
 0x134   :  { %v1439_v9 = vpop.eup %1438 }
 0x135   :  { %v744_v28 = vmul.f32 0.6931472, %v1439_v9  ;;  %v643_v53 = vpop.xlane.xlu0 %642  ;;  %v86_v9 = vld [vmem:[%s2594_s1 + $0xf0] sm:$0xff] }
 0x136   :  { %482 = vadd.xlane.f32.xlu0 %v481_v59 }
 0x137   :  { %v634_v61 = vpop.xlane.xlu2 %633 }
 0x139   :  { %v637_v56 = vpop.xlane.xlu1 %636 }
 0x13f   :  { %v640_v38 = vpop.xlane.xlu2 %639 }
 0x140   :  { %1440 = vlog2.f32 %v640_v38 }
 0x141   :  { %v646_v45 = vpop.xlane.xlu1 %645  ;;  %1442 = vlog2.f32 %v634_v61 }
 0x142   :  { %295 = vperm.xlu2 %1395, %v71_v55   ;;  %1444 = vlog2.f32 %v637_v56 }
 0x146   :  { %v1441_v13 = vpop.eup %1440 }
 0x147   :  { %v750_v48 = vmul.f32 0.6931472, %v1441_v13  ;;  %v1443_v63 = vpop.eup %1442 }
 0x148   :  { %v1445_v22 = vpop.eup %1444  ;;  %v746_v46 = vmul.f32 0.6931472, %v1443_v63  ;;  %v89_v63 = vld [vmem:[%s2594_s1 + $0x108] sm:$0xff] }
 0x149   :  { %v649_v6 = vpop.xlane.xlu1 %648  ;;  %v748_v50 = vmul.f32 0.6931472, %v1445_v22 }
 0x14a   :  { %301 = vperm.xlu0 %1396, %v73_v58   ;;  %304 = vperm.xlu2 %1395, %v74_v44   ;;  %1446 = vlog2.f32 %v649_v6  ;;  %v85_v44 = vld [vmem:[%s2594_s1 + $0xe8] sm:$0xff] }
 0x14d   :  { %v441_v34 = vpop.xlane.xlu2 %440 }
 0x14e   :  { %v819_v19 = vsub.f32 %v744_v28, %v441_v34 }
 0x150   :  { %v2174_v18 = vmax.f32 %v819_v19, 0.0  ;;  %v1447_v60 = vpop.eup %1446 }
 0x151   :  { %v756_v25 = vmul.f32 0.6931472, %v1447_v60 }
 0x152   :  { %310 = vperm.xlu0 %1396, %v76_v36   ;;  %313 = vperm.xlu2 %1395, %v77_v23   ;;  %v895_v3 = vsub.f32 0.0, %v2174_v18 }
 0x154   :  { %v933_v21 = vmul.f32 1.442695, %v895_v3 }
 0x155   :  { %v450_v37 = vpop.xlane.xlu1 %449 }
 0x156   :  { %v822_v32 = vsub.f32 %v750_v48, %v450_v37  ;;  %1448 = vpow2.f32 %v933_v21 }
 0x157   :  { %1450 = vlog2.f32 %v643_v53 }
 0x158   :  { %v2183_v30 = vmax.f32 %v822_v32, 0.0 }
 0x15a   :  { %319 = vperm.xlu0 %1396, %v79_v31   ;;  %322 = vperm.xlu2 %1395, %v80_v4   ;;  %v898_v26 = vsub.f32 0.0, %v2183_v30 }
 0x15c   :  { %v939_v59 = vmul.f32 1.442695, %v898_v26  ;;  %v1449_v28 = vpop.eup %1448 }
 0x15d   :  { %v658_v62 = vpop.xlane.xlu1 %657  ;;  %v1009_v23 = vsub.f32 1.0, %v1449_v28  ;;  %v1451_v37 = vpop.eup %1450 }
 0x15e   :  { %1452 = vpow2.f32 %v939_v59 }
 0x15f   :  { %1454 = vlog2.f32 %v646_v45  ;;  %v1047_v3 = vmul.f32 %v1009_v23, %v1009_v23  ;;  %v88_v45 = vld [vmem:[%s2594_s1 + $0x100] sm:$0xff] }
 0x161   :  { %v444_v27 = vpop.xlane.xlu0 %443 }
 0x162   :  { %v820_v1 = vsub.f32 %v746_v46, %v444_v27  ;;  %328 = vperm.xlu0 %1396, %v82_v12   ;;  %331 = vperm.xlu2 %1395, %v83_v47  }
 0x164   :  { %v858_v56 = vmax.f32 %v820_v1, 0.0  ;;  %v1453_v4 = vpop.eup %1452  ;;  %v1085_v1 = vmul.f32 %v1047_v3, %v2174_v18  ;;  %v92_v18 = vld [vmem:[%s2594_s1 + $0x120] sm:$0xff] }
 0x165   :  { %v447_v61 = vpop.xlane.xlu2 %446  ;;  %v459_v55 = vpop.xlane.xlu1 %458  ;;  %v1012_v22 = vsub.f32 1.0, %v1453_v4 }
 0x166   :  { %v896_v24 = vsub.f32 0.0, %v858_v56  ;;  %v821_v38 = vsub.f32 %v748_v50, %v447_v61  ;;  %v825_v58 = vsub.f32 %v756_v25, %v459_v55  ;;  %v1455_v53 = vpop.eup %1454  ;;  %v1280_v23 = vsel %vm1279_vm1, %v1085_v1, 0.0 }
 0x167   :  { %v754_v27 = vmul.f32 0.6931472, %v1455_v53 }
 0x168   :  { %v935_v6 = vmul.f32 1.442695, %v896_v24  ;;  %v859_v34 = vmax.f32 %v821_v38, 0.0  ;;  %v2198_v48 = vmax.f32 %v825_v58, 0.0  ;;  %v1050_v24 = vmul.f32 %v1012_v22, %v1012_v22 }
 0x169   :  { %v652_v19 = vpop.xlane.xlu0 %651 }
 0x16a   :  { %1456 = vpow2.f32 %v935_v6  ;;  %v897_v36 = vsub.f32 0.0, %v859_v34  ;;  %337 = vperm.xlu0 %1396, %v85_v44   ;;  %340 = vperm.xlu2 %1395, %v86_v9   ;;  %v901_v12 = vsub.f32 0.0, %v2198_v48  ;;  %v1088_v3 = vmul.f32 %v1050_v24, %v2183_v30 }
 0x16b   :  { %1458 = vlog2.f32 %v658_v62  ;;  %v752_v62 = vmul.f32 0.6931472, %v1451_v37 }
 0x16c   :  { %v937_v13 = vmul.f32 1.442695, %v897_v36  ;;  %v945_v61 = vmul.f32 1.442695, %v901_v12  ;;  %v1285_v22 = vsel %vm1279_vm1, %v1088_v3, 0.0 }
 0x16d   :  { %v655_v32 = vpop.xlane.xlu2 %654  ;;  %v667_v31 = vpop.xlane.xlu1 %666 }
 0x16e   :  { %1460 = vpow2.f32 %v937_v13 }
 0x16f   :  { %1462 = vlog2.f32 %v652_v19 }
 0x170   :  { %v1457_v21 = vpop.eup %1456  ;;  %1464 = vpow2.f32 %v945_v61 }
 0x171   :  { %v1459_v47 = vpop.eup %1458  ;;  %v1010_v46 = vsub.f32 1.0, %v1457_v21  ;;  %v453_v26 = vpop.xlane.xlu0 %452  ;;  %1466 = vlog2.f32 %v655_v32 }
 0x172   :  { %v823_v60 = vsub.f32 %v752_v62, %v453_v26  ;;  %346 = vperm.xlu0 %1396, %v88_v45   ;;  %349 = vperm.xlu2 %1395, %v89_v63   ;;  %v762_v59 = vmul.f32 0.6931472, %v1459_v47 }
 0x173   :  { %v1048_v50 = vmul.f32 %v1010_v46, %v1010_v46 }
 0x174   :  { %v1461_v25 = vpop.eup %1460  ;;  %v861_v55 = vmax.f32 %v823_v60, 0.0 }
 0x175   :  { %v1086_v38 = vmul.f32 %v1048_v50, %v858_v56  ;;  %v1011_v58 = vsub.f32 1.0, %v1461_v25  ;;  %v456_v44 = vpop.xlane.xlu2 %455  ;;  %v468_v9 = vpop.xlane.xlu1 %467  ;;  %v91_v56 = vld [vmem:[%s2594_s1 + $0x118] sm:$0xff] }
 0x176   :  { %v899_v28 = vsub.f32 0.0, %v861_v55  ;;  %v824_v6 = vsub.f32 %v754_v27, %v456_v44  ;;  %v828_v36 = vsub.f32 %v762_v59, %v468_v9  ;;  %v1463_v47 = vpop.eup %1462 }
 0x177   :  { %v1281_v13 = vsel %vm1279_vm1, %v1086_v38, 0.0  ;;  %v1049_v37 = vmul.f32 %v1011_v58, %v1011_v58  ;;  %v758_v50 = vmul.f32 0.6931472, %v1463_v47 }
 0x178   :  { %v1282_v4 = vadd.f32 %v1281_v13, %v1280_v23  ;;  %v941_v53 = vmul.f32 1.442695, %v899_v28  ;;  %v862_v63 = vmax.f32 %v824_v6, 0.0  ;;  %v2219_v26 = vmax.f32 %v828_v36, 0.0 }
 0x179   :  { %v1087_v45 = vmul.f32 %v1049_v37, %v859_v34  ;;  %v661_v21 = vpop.xlane.xlu0 %660  ;;  %v1465_v34 = vpop.eup %1464 }
 0x17a   :  { %1468 = vpow2.f32 %v941_v53  ;;  %358 = vperm.xlu0 %1396, %v92_v18   ;;  %355 = vperm.xlu2 %1395, %v91_v56   ;;  %v900_v62 = vsub.f32 0.0, %v862_v63  ;;  %v1467_v27 = vpop.eup %1466  ;;  %v1015_v59 = vsub.f32 1.0, %v1465_v34  ;;  %v904_v61 = vsub.f32 0.0, %v2219_v26 }
 0x17b   :  { %v1283_v19 = vsel %vm1279_vm1, %v1087_v45, 0.0  ;;  %1470 = vlog2.f32 %v667_v31  ;;  %v760_v44 = vmul.f32 0.6931472, %v1467_v27 }
 0x17c   :  { %v1284_v12 = vadd.f32 %v1283_v19, %v1282_v4  ;;  %v943_v46 = vmul.f32 1.442695, %v900_v62  ;;  %v1053_v36 = vmul.f32 %v1015_v59, %v1015_v59  ;;  %v951_v13 = vmul.f32 1.442695, %v904_v61 }
 0x17d   :  { %v664_v60 = vpop.xlane.xlu2 %663  ;;  %v2221_v30 = vpop.xlane.xlu1 %675 }
 0x17e   :  { %v1286_v32 = vadd.f32 %v1285_v22, %v1284_v12  ;;  %1472 = vpow2.f32 %v943_v46  ;;  %v1091_v46 = vmul.f32 %v1053_v36, %v2198_v48  ;;  %v1626_v48 = vld [vmem:[%s2593_s0 + $0xa0] sm:$0xff] }
 0x17f   :  { %1474 = vlog2.f32 %v661_v21 }
 0x180   :  { %v1469_v1 = vpop.eup %1468  ;;  %1476 = vpow2.f32 %v951_v13 }
 0x181   :  { %v1471_v25 = vpop.eup %1470  ;;  %v1013_v31 = vsub.f32 1.0, %v1469_v1  ;;  %v462_v24 = vpop.xlane.xlu0 %461 }
 0x182   :  { %v826_v38 = vsub.f32 %v758_v50, %v462_v24  ;;  %v768_v9 = vmul.f32 0.6931472, %v1471_v25 }
 0x183   :  { %v1051_v58 = vmul.f32 %v1013_v31, %v1013_v31 }
 0x184   :  { %v864_v28 = vmax.f32 %v826_v38, 0.0  ;;  %v1473_v6 = vpop.eup %1472 }
 0x185   :  { %v1089_v23 = vmul.f32 %v1051_v58, %v861_v55  ;;  %v477_v37 = vpop.xlane.xlu1 %476  ;;  %v465_v18 = vpop.xlane.xlu2 %464  ;;  %v1014_v56 = vsub.f32 1.0, %v1473_v6 }
 0x186   :  { %v902_v4 = vsub.f32 0.0, %v864_v28  ;;  %v831_v53 = vsub.f32 %v768_v9, %v477_v37  ;;  %v827_v3 = vsub.f32 %v760_v44, %v465_v18  ;;  %v1475_v1 = vpop.eup %1474 }
 0x187   :  { %v1287_v45 = vsel %vm1279_vm1, %v1089_v23, 0.0  ;;  %v1052_v62 = vmul.f32 %v1014_v56, %v1014_v56  ;;  %v1477_v31 = vpop.eup %1476 }
 0x188   :  { %v1288_v19 = vadd.f32 %v1287_v45, %v1286_v32  ;;  %v947_v12 = vmul.f32 1.442695, %v902_v4  ;;  %v865_v47 = vmax.f32 %v827_v3, 0.0  ;;  %v2227_v25 = vmax.f32 %v831_v53, 0.0 }
 0x189   :  { %v670_v22 = vpop.xlane.xlu0 %669  ;;  %v1090_v34 = vmul.f32 %v1052_v62, %v862_v63  ;;  %v1291_v32 = vsel %vm1279_vm1, %v1091_v46, 0.0  ;;  %v2234_v63 = vsub.f32 %v1626_v48, %v1969_v5  ;;  %v1018_v36 = vsub.f32 1.0, %v1477_v31 }
 0x18a   :  { %1478 = vpow2.f32 %v947_v12  ;;  %v903_v55 = vsub.f32 0.0, %v865_v47  ;;  %v907_v44 = vsub.f32 0.0, %v2227_v25 }
 0x18b   :  { %1480 = vlog2.f32 %v664_v60  ;;  %v1289_v27 = vsel %vm1279_vm1, %v1090_v34, 0.0  ;;  %v764_v60 = vmul.f32 0.6931472, %v1475_v1  ;;  %v593_v13 = vmul.f32 1.442695, %v2234_v63 }
 0x18c   :  { %v1290_v50 = vadd.f32 %v1289_v27, %v1288_v19  ;;  %v949_v59 = vmul.f32 1.442695, %v903_v55  ;;  %v957_v4 = vmul.f32 1.442695, %v907_v44  ;;  %v1056_v19 = vmul.f32 %v1018_v36, %v1018_v36 }
 0x18d   :  { %v673_v21 = vpop.xlane.xlu2 %672 }
 0x18e   :  { %v1292_v61 = vadd.f32 %v1291_v32, %v1290_v50  ;;  %1482 = vpow2.f32 %v949_v59 }
 0x18f   :  { %1484 = vlog2.f32 %v670_v22 }
 0x190   :  { %v1479_v24 = vpop.eup %1478  ;;  %1486 = vpow2.f32 %v593_v13 }
 0x191   :  { %v1481_v38 = vpop.eup %1480  ;;  %v1016_v58 = vsub.f32 1.0, %v1479_v24  ;;  %v471_v9 = vpop.xlane.xlu0 %470  ;;  %1488 = vpow2.f32 %v957_v4 }
 0x192   :  { %v829_v6 = vsub.f32 %v764_v60, %v471_v9  ;;  %v766_v37 = vmul.f32 0.6931472, %v1481_v38 }
 0x193   :  { %v1054_v23 = vmul.f32 %v1016_v58, %v1016_v58 }
 0x194   :  { %v867_v18 = vmax.f32 %v829_v6, 0.0  ;;  %v1483_v3 = vpop.eup %1482 }
 0x195   :  { %v1092_v56 = vmul.f32 %v1054_v23, %v864_v28  ;;  %v474_v53 = vpop.xlane.xlu2 %473  ;;  %v1017_v12 = vsub.f32 1.0, %v1483_v3  ;;  %v1094_v28 = vmul.f32 %v1056_v19, %v2219_v26  ;;  %v1485_v32 = vpop.eup %1484 }
 0x196   :  { %v905_v5 = vsub.f32 0.0, %v867_v18  ;;  %v830_v45 = vsub.f32 %v766_v37, %v474_v53  ;;  %v1487_v22 = vpop.eup %1486  ;;  %v770_v44 = vmul.f32 0.6931472, %v1485_v32 }
 0x197   :  { %v1293_v62 = vsel %vm1279_vm1, %v1092_v56, 0.0  ;;  %v1055_v55 = vmul.f32 %v1017_v12, %v1017_v12  ;;  %v1297_v38 = vsel %vm1279_vm1, %v1094_v28, 0.0  ;;  %v689_v23 = vsel %vm94_vm0, %v1487_v22, 0.0 }
 0x198   :  { %v1294_v46 = vadd.f32 %v1293_v62, %v1292_v61  ;;  %v953_v34 = vmul.f32 1.442695, %v905_v5  ;;  %v868_v27 = vmax.f32 %v830_v45, 0.0  ;;  %v1489_v61 = vpop.eup %1488 }
 0x199   :  { %v2239_v1 = vpop.xlane.xlu0 %678  ;;  %v1093_v50 = vmul.f32 %v1055_v55, %v865_v47  ;;  %v1021_v47 = vsub.f32 1.0, %v1489_v61 }
 0x19a   :  { %1490 = vpow2.f32 %v953_v34  ;;  %v906_v59 = vsub.f32 0.0, %v868_v27 }
 0x19b   :  { %v1295_v31 = vsel %vm1279_vm1, %v1093_v50, 0.0  ;;  %1492 = vlog2.f32 %v673_v21  ;;  %v1059_v3 = vmul.f32 %v1021_v47, %v1021_v47 }
 0x19c   :  { %v955_v24 = vmul.f32 1.442695, %v906_v59  ;;  %v1296_v60 = vadd.f32 %v1295_v31, %v1294_v46 }
 0x19d   :  { %v2243_v48 = vpop.xlane.xlu2 %681 }
 0x19e   :  { %1494 = vpow2.f32 %v955_v24  ;;  %v1298_v9 = vadd.f32 %v1297_v38, %v1296_v60 }
 0x1a0   :  { %v1491_v58 = vpop.eup %1490 }
 0x1a1   :  { %v1019_v6 = vsub.f32 1.0, %v1491_v58  ;;  %v480_v26 = vpop.xlane.xlu0 %479  ;;  %v1493_v37 = vpop.eup %1492 }
 0x1a2   :  { %v832_v36 = vsub.f32 %v770_v44, %v480_v26  ;;  %v772_v19 = vmul.f32 0.6931472, %v1493_v37 }
 0x1a3   :  { %v1057_v13 = vmul.f32 %v1019_v6, %v1019_v6  ;;  %690 = vadd.xlane.f32.xlu2 %v689_v23 }
 0x1a4   :  { %v870_v56 = vmax.f32 %v832_v36, 0.0  ;;  %v1495_v4 = vpop.eup %1494 }
 0x1a5   :  { %v1095_v53 = vmul.f32 %v1057_v13, %v867_v18  ;;  %v296_v21 = vpop.permute.xlu2 %295  ;;  %v1020_v5 = vsub.f32 1.0, %v1495_v4  ;;  %v1097_v18 = vmul.f32 %v1059_v3, %v2227_v25 }
 0x1a6   :  { %v908_v45 = vsub.f32 0.0, %v870_v56  ;;  %vm378_vm2 = vcmp.eq.s32.totalorder %v2028_v0, %v296_v21 }
 0x1a7   :  { %v1299_v62 = vsel %vm1279_vm1, %v1095_v53, 0.0  ;;  %v416_v12 = vsel %vm378_vm2, %v2085_v8, 0.0  ;;  %v1058_v34 = vmul.f32 %v1020_v5, %v1020_v5  ;;  %v1303_v60 = vsel %vm1279_vm1, %v1097_v18, 0.0 }
 0x1a8   :  { %v1300_v46 = vadd.f32 %v1299_v62, %v1298_v9  ;;  %v959_v55 = vmul.f32 1.442695, %v908_v45  ;;  %v484_v28 = vsel %vm94_vm0, %v416_v12, 0.0  ;;  %v81_v62 = vld [vmem:[%s2594_s1 + $0xc8] sm:$0xff]  ;;  %v87_v12 = vld [vmem:[%s2594_s1 + $0xf8] sm:$0xff] }
 0x1a9   :  { %v483_v50 = vpop.xlane.xlu0 %482  ;;  %485 = vadd.xlane.f32.xlu1 %v484_v28  ;;  %v1096_v59 = vmul.f32 %v1058_v34, %v868_v27  ;;  %v93_v34 = vld [vmem:[%s2594_s1 + $0x128] sm:$0xff] }
 0x1aa   :  { %1496 = vpow2.f32 %v959_v55  ;;  %v833_v32 = vsub.f32 %v772_v19, %v483_v50  ;;  %v78_v19 = vld [vmem:[%s2594_s1 + $0xb0] sm:$0xff]  ;;  %v2286_v55 = vpop.xlane.xlu1 %684  ;;  %v1627_v28 = vld [vmem:[%s2593_s0 + $0xa8] sm:$0xff] }
 0x1ab   :  { %v1301_v31 = vsel %vm1279_vm1, %v1096_v59, 0.0  ;;  %v230_v50 = vsub.f32 %v1627_v28, %v1978_v17 }
 0x1ac   :  { %v871_v24 = vmax.f32 %v833_v32, 0.0  ;;  %v1302_v22 = vadd.f32 %v1301_v31, %v1300_v46  ;;  %v90_v46 = vld [vmem:[%s2594_s1 + $0x110] sm:$0xff]  ;;  %v1628_v31 = vld [vmem:[%s2593_s0 + $0xc0] sm:$0xff] }
 0x1ad   :  { %v305_v37 = vpop.permute.xlu2 %304  ;;  %v595_v59 = vmul.f32 1.442695, %v230_v50 }
 0x1ae   :  { %v909_v61 = vsub.f32 0.0, %v871_v24  ;;  %v1304_v8 = vadd.f32 %v1303_v60, %v1302_v22  ;;  %vm381_vm4 = vcmp.eq.s32.totalorder %v2028_v0, %v305_v37 }
 0x1af   :  { %v419_v5 = vsel %vm381_vm4, %v2112_v41, 0.0  ;;  %v84_v41 = vld [vmem:[%s2594_s1 + $0xe0] sm:$0xff] }
 0x1b0   :  { %v1497_v38 = vpop.eup %1496  ;;  %v961_v58 = vmul.f32 1.442695, %v909_v61  ;;  %v493_v45 = vsel %vm94_vm0, %v419_v5, 0.0 }
 0x1b1   :  { %v1022_v44 = vsub.f32 1.0, %v1497_v38 }
 0x1b2   :  { %1498 = vpow2.f32 %v961_v58  ;;  %v2293_v18 = vpop.xlane.xlu1 %687 }
 0x1b3   :  { %v1060_v9 = vmul.f32 %v1022_v44, %v1022_v44  ;;  %1500 = vlog2.f32 %v2221_v30 }
 0x1b4   :  { %1502 = vpow2.f32 %v595_v59 }
 0x1b5   :  { %v1098_v6 = vmul.f32 %v1060_v9, %v870_v56  ;;  %v72_v56 = vld [vmem:[%s2594_s1 + $0x80] sm:$0xff] }
 0x1b7   :  { %v1305_v26 = vsel %vm1279_vm1, %v1098_v6, 0.0 }
 0x1b8   :  { %v1499_v25 = vpop.eup %1498  ;;  %v1306_v27 = vadd.f32 %v1305_v26, %v1304_v8  ;;  %v314_v26 = vpop.permute.xlu2 %313 }
 0x1b9   :  { %v1023_v47 = vsub.f32 1.0, %v1499_v25  ;;  %v1501_v32 = vpop.eup %1500  ;;  %vm384_vm5 = vcmp.eq.s32.totalorder %v2028_v0, %v314_v26 }
 0x1ba   :  { %v774_v22 = vmul.f32 0.6931472, %v1501_v32  ;;  %v1503_v38 = vpop.eup %1502 }
 0x1bb   :  { %v1061_v36 = vmul.f32 %v1023_v47, %v1023_v47  ;;  %v692_v44 = vsel %vm94_vm0, %v1503_v38, 0.0 }
 0x1bc   :  { %v302_v23 = vpop.permute.xlu0 %301 }
 0x1bd   :  { %v1099_v13 = vmul.f32 %v1061_v36, %v871_v24  ;;  %vm380_vm3 = vcmp.eq.s32.totalorder %v2028_v0, %v302_v23  ;;  %v2299_v24 = vsub.f32 %v1628_v31, %v1996_v33  ;;  %v1629_v33 = vld [vmem:[%s2593_s0 + $0xd8] sm:$0xff]  ;;  %v1630_v36 = vld [vmem:[%s2593_s0 + $0xb0] sm:$0xff] }
 0x1be   :  { %v418_v4 = vsel %vm380_vm3, %v2139_v11, 0.0  ;;  %v75_v11 = vld [vmem:[%s2594_s1 + $0x98] sm:$0xff]  ;;  %v2307_v6 = vsub.f32 %v1629_v33, %v2009_v7  ;;  %v2315_v23 = vsub.f32 %v1630_v36, %v1990_v2 }
 0x1bf   :  { %v1307_v53 = vsel %vm1279_vm1, %v1099_v13, 0.0  ;;  %v490_v21 = vsel %vm94_vm0, %v418_v4, 0.0  ;;  %v601_v8 = vmul.f32 1.442695, %v2299_v24  ;;  %v422_v4 = vsel %vm384_vm5, %v230_v50, 0.0  ;;  %v1631_v2 = vld [vmem:[%s2593_s0 + $0xb8] sm:$0xff] }
 0x1c0   :  { %v1308_v3 = vadd.f32 %v1307_v53, %v1306_v27  ;;  %491 = vadd.xlane.f32.xlu2 %v490_v21  ;;  %v607_v13 = vmul.f32 1.442695, %v2307_v6  ;;  %v597_v53 = vmul.f32 1.442695, %v2315_v23  ;;  %v502_v5 = vsel %vm94_vm0, %v422_v4, 0.0  ;;  %v323_v50 = vpop.permute.xlu2 %322 }
 0x1c1   :  { %1504 = vpow2.f32 %v601_v8  ;;  %vm387_vm7 = vcmp.eq.s32.totalorder %v2028_v0, %v323_v50 }
 0x1c2   :  { %298 = vperm.xlu1 %1397, %v72_v56  }
 0x1c7   :  { %v1505_v9 = vpop.eup %1504 }
 0x1c8   :  { %494 = vadd.xlane.f32.xlu2 %v493_v45  ;;  %v701_v27 = vsel %vm94_vm0, %v1505_v9, 0.0 }
 0x1ca   :  { %307 = vperm.xlu1 %1397, %v75_v11   ;;  %v2327_v11 = vsub.f32 %v1631_v2, %v1976_v16  ;;  %v1637_v2 = vld [vmem:[%s2593_s0 + $0xe8] sm:$0xff] }
 0x1d2   :  { %316 = vperm.xlu1 %1397, %v78_v19   ;;  %v1632_v19 = vld [vmem:[%s2593_s0 + $0xc8] sm:$0xff] }
 0x1da   :  { %325 = vperm.xlu1 %1397, %v81_v62  }
 0x1e2   :  { %334 = vperm.xlu1 %1397, %v84_v41  }
 0x1ea   :  { %343 = vperm.xlu1 %1397, %v87_v12  }
 0x1f2   :  { %352 = vperm.xlu1 %1397, %v90_v46   ;;  %v599_v46 = vmul.f32 1.442695, %v2327_v11 }
 0x1fa   :  { %361 = vperm.xlu1 %1397, %v93_v34   ;;  %v1633_v34 = vld [vmem:[%s2593_s0 + $0xf0] sm:$0xff] }
 0x1fb   :  { %v2344_v28 = vsub.f32 %v1633_v34, %v2020_v15 }
 0x1fd   :  { %v613_v32 = vmul.f32 1.442695, %v2344_v28 }
 0x21c   :  { %v486_v60 = vpop.xlane.xlu1 %485 }
 0x21d   :  { %v834_v61 = vsub.f32 %v774_v22, %v486_v60  ;;  %v311_v60 = vpop.permute.xlu0 %310 }
 0x21e   :  { %vm383_vm9 = vcmp.eq.s32.totalorder %v2028_v0, %v311_v60 }
 0x21f   :  { %v872_v17 = vmax.f32 %v834_v61, 0.0  ;;  %v425_v61 = vsel %vm387_vm7, %v2299_v24, 0.0 }
 0x221   :  { %v910_v30 = vsub.f32 0.0, %v872_v17 }
 0x223   :  { %v963_v58 = vmul.f32 1.442695, %v910_v30  ;;  %v1634_v30 = vld [vmem:[%s2593_s0 + $0xd0] sm:$0xff] }
 0x224   :  { %693 = vadd.xlane.f32.xlu1 %v692_v44 }
 0x225   :  { %1506 = vpow2.f32 %v963_v58  ;;  %v1635_v58 = vld [vmem:[%s2593_s0 + $0xe0] sm:$0xff]  ;;  %v320_v36 = vpop.permute.xlu0 %319 }
 0x226   :  { %1508 = vpow2.f32 %v607_v13  ;;  %v2365_v44 = vsub.f32 %v1635_v58, %v2017_v57  ;;  %v1636_v57 = vld [vmem:[%s2593_s0 + $0x108] sm:$0xff]  ;;  %vm386_vm12 = vcmp.eq.s32.totalorder %v2028_v0, %v320_v36 }
 0x227   :  { %1510 = vpow2.f32 %v597_v53 }
 0x228   :  { %1512 = vpow2.f32 %v599_v46 }
 0x22b   :  { %v1507_v25 = vpop.eup %1506 }
 0x22c   :  { %v1024_v47 = vsub.f32 1.0, %v1507_v25  ;;  %702 = vadd.xlane.f32.xlu1 %v701_v27  ;;  %v1509_v12 = vpop.eup %1508  ;;  %v2377_v27 = vsub.f32 %v1636_v57, %v2031_v39 }
 0x22d   :  { %v1511_v59 = vpop.eup %1510 }
 0x22e   :  { %v1062_v37 = vmul.f32 %v1024_v47, %v1024_v47  ;;  %v695_v22 = vsel %vm94_vm0, %v1511_v59, 0.0  ;;  %v1513_v8 = vpop.eup %1512  ;;  %v332_v47 = vpop.permute.xlu2 %331  ;;  %v619_v4 = vmul.f32 1.442695, %v2377_v27 }
 0x22f   :  { %v698_v9 = vsel %vm94_vm0, %v1513_v8, 0.0  ;;  %vm390_vm11 = vcmp.eq.s32.totalorder %v2028_v0, %v332_v47  ;;  %v1640_v8 = vld [vmem:[%s2593_s0 + $0x100] sm:$0xff] }
 0x230   :  { %v1100_v7 = vmul.f32 %v1062_v37, %v872_v17  ;;  %v511_v17 = vsel %vm94_vm0, %v425_v61, 0.0 }
 0x232   :  { %v1309_v21 = vsel %vm1279_vm1, %v1100_v7, 0.0  ;;  %v421_v7 = vsel %vm383_vm9, %v2234_v63, 0.0  ;;  %v329_v63 = vpop.permute.xlu0 %328 }
 0x233   :  { %v2320_v56 = vadd.f32 %v1309_v21, %v1308_v3  ;;  %v2334_v3 = vsub.f32 %v1632_v19, %v2003_v40  ;;  %v710_v40 = vsel %vm94_vm0, %v1509_v12, 0.0  ;;  %v499_v39 = vsel %vm94_vm0, %v421_v7, 0.0 }
 0x234   :  { %v299_v45 = vpop.permute.xlu1 %298  ;;  %503 = vadd.xlane.f32.xlu1 %v502_v5  ;;  %v428_v21 = vsel %vm390_vm11, %v2307_v6, 0.0  ;;  %v2392_v19 = vsub.f32 %v1637_v2, %v2005_v43  ;;  %vm389_vm15 = vcmp.eq.s32.totalorder %v2028_v0, %v329_v63  ;;  %vm16_vm11 = vcmask 0  }
 0x235   :  { %vm379_vm6 = vcmp.eq.s32.totalorder %v2028_v0, %v299_v45  ;;  %v603_v16 = vmul.f32 1.442695, %v2334_v3 }
 0x236   :  { %v417_v62 = vsel %vm379_vm6, %v2132_v54, 0.0  ;;  %v611_v34 = vmul.f32 1.442695, %v2392_v19 }
 0x237   :  { %v487_v41 = vsel %vm94_vm0, %v417_v62, 0.0  ;;  %1514 = vpow2.f32 %v603_v16  ;;  %v1638_v62 = vld [vmem:[%s2593_s0 + $0xf8] sm:$0xff] }
 0x238   :  { %488 = vadd.xlane.f32.xlu0 %v487_v41  ;;  %1516 = vpow2.f32 %v613_v32  ;;  %v2398_v6 = vsub.f32 %v1638_v62, %v2025_v29  ;;  %v1639_v29 = vld [vmem:[%s2593_s0 + $0x120] sm:$0xff]  ;;  %v424_v32 = vsel %vm386_vm12, %v2327_v11, 0.0 }
 0x239   :  { %v245_v50 = vsub.f32 %v1639_v29, %v2043_v52  ;;  %v508_v60 = vsel %vm94_vm0, %v424_v32, 0.0 }
 0x23a   :  { %v615_v43 = vmul.f32 1.442695, %v2398_v6 }
 0x23c   :  { %v308_v54 = vpop.permute.xlu1 %307  ;;  %711 = vadd.xlane.f32.xlu1 %v710_v40  ;;  %v341_v40 = vpop.permute.xlu2 %340 }
 0x23d   :  { %vm382_vm8 = vcmp.eq.s32.totalorder %v2028_v0, %v308_v54  ;;  %v1515_v38 = vpop.eup %1514  ;;  %vm393_vm14 = vcmp.eq.s32.totalorder %v2028_v0, %v341_v40 }
 0x23e   :  { %v420_v31 = vsel %vm382_vm8, %v2126_v20, 0.0  ;;  %v2359_v20 = vsub.f32 %v1634_v30, %v1993_v35  ;;  %v704_v33 = vsel %vm94_vm0, %v1515_v38, 0.0  ;;  %v1517_v26 = vpop.eup %1516  ;;  %v609_v35 = vmul.f32 1.442695, %v2365_v44  ;;  %v1641_v38 = vld [vmem:[%s2593_s0 + $0x110] sm:$0xff] }
 0x23f   :  { %v496_v15 = vsel %vm94_vm0, %v420_v31, 0.0  ;;  %v719_v13 = vsel %vm94_vm0, %v1517_v26, 0.0  ;;  %v625_v31 = vmul.f32 1.442695, %v245_v50  ;;  %v431_v52 = vsel %vm393_vm14, %v2344_v28, 0.0 }
 0x240   :  { %696 = vadd.xlane.f32.xlu0 %v695_v22  ;;  %497 = vadd.xlane.f32.xlu2 %v496_v15  ;;  %v605_v25 = vmul.f32 1.442695, %v2359_v20  ;;  %v2414_v22 = vpop.permute.xlu0 %337  ;;  %v2430_v30 = vsub.f32 %v1641_v38, %v2040_v42  ;;  %v427_v57 = vsel %vm389_vm15, %v2359_v20, 0.0  ;;  %v1642_v20 = vld [vmem:[%s2593_s0 + $0x118] sm:$0xff] }
 0x241   :  { %v517_v36 = vsel %vm94_vm0, %v427_v57, 0.0  ;;  %vm392_vm5 = vcmp.eq.s32.totalorder %v2028_v0, %v2414_v22 }
 0x242   :  { %1518 = vpow2.f32 %v605_v25  ;;  %v621_v26 = vmul.f32 1.442695, %v2430_v30  ;;  %v430_v62 = vsel %vm392_vm5, %v2392_v19, 0.0 }
 0x243   :  { %1520 = vpow2.f32 %v609_v35 }
 0x244   :  { %512 = vadd.xlane.f32.xlu1 %v511_v17  ;;  %v317_v24 = vpop.permute.xlu1 %316  ;;  %1522 = vpow2.f32 %v619_v4  ;;  %v2424_v17 = vsub.f32 %v1640_v8, %v2015_v51  ;;  %v350_v42 = vpop.permute.xlu2 %349 }
 0x245   :  { %vm385_vm10 = vcmp.eq.s32.totalorder %v2028_v0, %v317_v24  ;;  %1524 = vpow2.f32 %v611_v34  ;;  %vm396_vm3 = vcmp.eq.s32.totalorder %v2028_v0, %v350_v42 }
 0x246   :  { %v423_v37 = vsel %vm385_vm10, %v2315_v23, 0.0  ;;  %v520_v23 = vsel %vm94_vm0, %v428_v21, 0.0  ;;  %1526 = vpow2.f32 %v615_v43  ;;  %v617_v51 = vmul.f32 1.442695, %v2424_v17 }
 0x247   :  { %v505_v53 = vsel %vm94_vm0, %v423_v37, 0.0  ;;  %1528 = vpow2.f32 %v625_v31 }
 0x248   :  { %699 = vadd.xlane.f32.xlu0 %v698_v9  ;;  %705 = vadd.xlane.f32.xlu2 %v704_v33  ;;  %v1519_v5 = vpop.eup %1518  ;;  %v2434_v33 = vpop.permute.xlu0 %346  ;;  %1530 = vpow2.f32 %v617_v51 }
 0x249   :  { %v1521_v45 = vpop.eup %1520  ;;  %v707_v46 = vsel %vm94_vm0, %v1519_v5, 0.0  ;;  %1532 = vpow2.f32 %v621_v26  ;;  %vm395_vm8 = vcmp.eq.s32.totalorder %v2028_v0, %v2434_v33 }
 0x24a   :  { %v713_v12 = vsel %vm94_vm0, %v1521_v45, 0.0  ;;  %v1523_v16 = vpop.eup %1522  ;;  %v433_v40 = vsel %vm395_vm8, %v2424_v17, 0.0 }
 0x24b   :  { %v728_v59 = vsel %vm94_vm0, %v1523_v16, 0.0  ;;  %v1525_v61 = vpop.eup %1524  ;;  %v535_v32 = vsel %vm94_vm0, %v433_v40, 0.0 }
 0x24c   :  { %720 = vadd.xlane.f32.xlu1 %v719_v13  ;;  %v326_v41 = vpop.permute.xlu1 %325  ;;  %v1527_v11 = vpop.eup %1526  ;;  %v716_v24 = vsel %vm94_vm0, %v1525_v61, 0.0  ;;  %v434_v13 = vsel %vm396_vm3, %v2377_v27, 0.0  ;;  %v1643_v27 = vld [vmem:[%s2593_s0 + $0x128] sm:$0xff] }
 0x24d   :  { %vm388_vm13 = vcmp.eq.s32.totalorder %v2028_v0, %v326_v41  ;;  %v722_v58 = vsel %vm94_vm0, %v1527_v11, 0.0  ;;  %v1529_v9 = vpop.eup %1528  ;;  %v538_v4 = vsel %vm94_vm0, %v434_v13, 0.0  ;;  %v356_v16 = vpop.permute.xlu2 %355 }
 0x24e   :  { %v426_v54 = vsel %vm388_vm13, %v2334_v3, 0.0  ;;  %v529_v3 = vsel %vm94_vm0, %v431_v52, 0.0  ;;  %v737_v25 = vsel %vm94_vm0, %v1529_v9, 0.0  ;;  %v1531_v7 = vpop.eup %1530  ;;  %vm398_vm7 = vcmp.eq.s32.totalorder %v2028_v0, %v356_v16 }
 0x24f   :  { %v514_v15 = vsel %vm94_vm0, %v426_v54, 0.0 }
 0x250   :  { %506 = vadd.xlane.f32.xlu2 %v505_v53  ;;  %500 = vadd.xlane.f32.xlu0 %v499_v39  ;;  %v359_v37 = vpop.permute.xlu0 %358  ;;  %v1533_v53 = vpop.eup %1532  ;;  %v246_v39 = vsub.f32 %v1643_v27, %v2050_v10 }
 0x251   :  { %vm399_vm4 = vcmp.eq.s32.totalorder %v2028_v0, %v359_v37  ;;  %v731_v5 = vsel %vm94_vm0, %v1533_v53, 0.0 }
 0x252   :  { %v437_v45 = vsel %vm399_vm4, %v245_v50, 0.0 }
 0x253   :  { %v547_v2 = vsel %vm94_vm0, %v437_v45, 0.0 }
 0x254   :  { %521 = vadd.xlane.f32.xlu1 %v520_v23  ;;  %v335_v28 = vpop.permute.xlu1 %334  ;;  %v725_v23 = vsel %vm94_vm0, %v1531_v7, 0.0 }
 0x255   :  { %vm391_vm2 = vcmp.eq.s32.totalorder %v2028_v0, %v335_v28  ;;  %v691_v19 = vpop.xlane.xlu2 %690 }
 0x256   :  { %v429_v35 = vsel %vm391_vm2, %v2365_v44, 0.0  ;;  %v244_v44 = vsub.f32 %v1642_v20, %v2023_v14  ;;  %v627_v14 = vmul.f32 1.442695, %v246_v39 }
 0x257   :  { %v523_v47 = vsel %vm94_vm0, %v429_v35, 0.0 }
 0x258   :  { %714 = vadd.xlane.f32.xlu2 %v713_v12  ;;  %708 = vadd.xlane.f32.xlu0 %v707_v46  ;;  %v623_v63 = vmul.f32 1.442695, %v244_v44  ;;  %v526_v12 = vsel %vm94_vm0, %v430_v62, 0.0 }
 0x25a   :  { %1534 = vpow2.f32 %v623_v63 }
 0x25b   :  { %1536 = vpow2.f32 %v627_v14 }
 0x25c   :  { %729 = vadd.xlane.f32.xlu1 %v728_v59  ;;  %v344_v21 = vpop.permute.xlu1 %343  ;;  %1538 = vlog2.f32 %v2243_v48 }
 0x25d   :  { %vm394_vm6 = vcmp.eq.s32.totalorder %v2028_v0, %v344_v21  ;;  %v492_v31 = vpop.xlane.xlu2 %491  ;;  %1540 = vlog2.f32 %v2286_v55 }
 0x25e   :  { %v432_v10 = vsel %vm394_vm6, %v2398_v6, 0.0  ;;  %v436_v6 = vsel %vm398_vm7, %v244_v44, 0.0  ;;  %1542 = vlog2.f32 %v2239_v1 }
 0x25f   :  { %v532_v41 = vsel %vm94_vm0, %v432_v10, 0.0  ;;  %v544_v54 = vsel %vm94_vm0, %v436_v6, 0.0  ;;  %1544 = vlog2.f32 %v2293_v18 }
 0x260   :  { %515 = vadd.xlane.f32.xlu2 %v514_v15  ;;  %509 = vadd.xlane.f32.xlu0 %v508_v60  ;;  %v1535_v46 = vpop.eup %1534 }
 0x261   :  { %v1537_v34 = vpop.eup %1536  ;;  %v734_v50 = vsel %vm94_vm0, %v1535_v46, 0.0 }
 0x262   :  { %v740_v29 = vsel %vm94_vm0, %v1537_v34, 0.0  ;;  %v1539_v52 = vpop.eup %1538 }
 0x263   :  { %v1541_v61 = vpop.eup %1540 }
 0x264   :  { %530 = vadd.xlane.f32.xlu1 %v529_v3  ;;  %v353_v43 = vpop.permute.xlu1 %352  ;;  %v778_v3 = vmul.f32 0.6931472, %v1539_v52  ;;  %v780_v17 = vmul.f32 0.6931472, %v1541_v61  ;;  %v1543_v9 = vpop.eup %1542 }
 0x265   :  { %vm397_vm9 = vcmp.eq.s32.totalorder %v2028_v0, %v353_v43  ;;  %v495_v8 = vpop.xlane.xlu2 %494  ;;  %v776_v51 = vmul.f32 0.6931472, %v1543_v9 }
 0x266   :  { %v435_v22 = vsel %vm397_vm9, %v2430_v30, 0.0  ;;  %v836_v38 = vsub.f32 %v778_v3, %v492_v31  ;;  %v837_v28 = vsub.f32 %v780_v17, %v495_v8 }
 0x267   :  { %v541_v60 = vsel %vm94_vm0, %v435_v22, 0.0 }
 0x268   :  { %723 = vadd.xlane.f32.xlu2 %v722_v58  ;;  %717 = vadd.xlane.f32.xlu0 %v716_v24  ;;  %v874_v55 = vmax.f32 %v836_v38, 0.0  ;;  %v875_v58 = vmax.f32 %v837_v28, 0.0 }
 0x26a   :  { %v912_v24 = vsub.f32 0.0, %v874_v55 }
 0x26c   :  { %738 = vadd.xlane.f32.xlu1 %v737_v25  ;;  %v362_v59 = vpop.permute.xlu1 %361  ;;  %v967_v26 = vmul.f32 1.442695, %v912_v24 }
 0x26d   :  { %vm400_vm10 = vcmp.eq.s32.totalorder %v2028_v0, %v362_v59  ;;  %v913_v0 = vsub.f32 0.0, %v875_v58 }
 0x26e   :  { %v438_v11 = vsel %vm400_vm10, %v246_v39, 0.0  ;;  %1546 = vpow2.f32 %v967_v26 }
 0x26f   :  { %v550_v30 = vsel %vm94_vm0, %v438_v11, 0.0  ;;  %v969_v25 = vmul.f32 1.442695, %v913_v0 }
 0x270   :  { %524 = vadd.xlane.f32.xlu2 %v523_v47  ;;  %518 = vadd.xlane.f32.xlu0 %v517_v36  ;;  %v1545_v47 = vpop.eup %1544 }
 0x271   :  { %1548 = vpow2.f32 %v969_v25  ;;  %v782_v13 = vmul.f32 0.6931472, %v1545_v47 }
 0x274   :  { %539 = vadd.xlane.f32.xlu1 %v538_v4  ;;  %v1547_v53 = vpop.eup %1546 }
 0x275   :  { %v1026_v27 = vsub.f32 1.0, %v1547_v53 }
 0x277   :  { %v1549_v18 = vpop.eup %1548  ;;  %v1064_v45 = vmul.f32 %v1026_v27, %v1026_v27 }
 0x278   :  { %732 = vadd.xlane.f32.xlu2 %v731_v5  ;;  %726 = vadd.xlane.f32.xlu0 %v725_v23  ;;  %v1027_v39 = vsub.f32 1.0, %v1549_v18 }
 0x279   :  { %v1102_v46 = vmul.f32 %v1064_v45, %v874_v55 }
 0x27a   :  { %v1065_v10 = vmul.f32 %v1027_v39, %v1027_v39 }
 0x27c   :  { %548 = vadd.xlane.f32.xlu1 %v547_v2  ;;  %v1103_v34 = vmul.f32 %v1065_v10, %v875_v58 }
 0x27e   :  { %v1315_v31 = vsel %vm1279_vm1, %v1103_v34, 0.0 }
 0x280   :  { %533 = vadd.xlane.f32.xlu2 %v532_v41  ;;  %527 = vadd.xlane.f32.xlu0 %v526_v12 }
 0x288   :  { %741 = vadd.xlane.f32.xlu2 %v740_v29  ;;  %735 = vadd.xlane.f32.xlu0 %v734_v50 }
 0x290   :  { %545 = vadd.xlane.f32.xlu2 %v544_v54  ;;  %536 = vadd.xlane.f32.xlu0 %v535_v32 }
 0x297   :  { %v2479_v15 = vpop.xlane.xlu1 %693 }
 0x298   :  { %542 = vadd.xlane.f32.xlu0 %v541_v60 }
 0x29f   :  { %v2483_v48 = vpop.xlane.xlu1 %702 }
 0x2a0   :  { %551 = vadd.xlane.f32.xlu0 %v550_v30 }
 0x2a7   :  { %v2487_v33 = vpop.xlane.xlu1 %503 }
 0x2ab   :  { %v489_v42 = vpop.xlane.xlu0 %488 }
 0x2ac   :  { %v835_v35 = vsub.f32 %v776_v51, %v489_v42 }
 0x2ae   :  { %v873_v57 = vmax.f32 %v835_v35, 0.0 }
 0x2af   :  { %v2490_v1 = vpop.xlane.xlu1 %711 }
 0x2b0   :  { %v911_v36 = vsub.f32 0.0, %v873_v57 }
 0x2b2   :  { %v965_v37 = vmul.f32 1.442695, %v911_v36 }
 0x2b3   :  { %v498_v7 = vpop.xlane.xlu2 %497  ;;  %v697_v4 = vpop.xlane.xlu0 %696 }
 0x2b4   :  { %1550 = vpow2.f32 %v965_v37  ;;  %v838_v20 = vsub.f32 %v782_v13, %v498_v7 }
 0x2b5   :  { %1552 = vlog2.f32 %v691_v19  ;;  %v1313_v19 = vsel %vm1279_vm1, %v1102_v46, 0.0 }
 0x2b6   :  { %v876_v44 = vmax.f32 %v838_v20, 0.0 }
 0x2b7   :  { %v2492_v23 = vpop.xlane.xlu1 %512 }
 0x2b8   :  { %v914_v21 = vsub.f32 0.0, %v876_v44 }
 0x2ba   :  { %v1551_v5 = vpop.eup %1550  ;;  %v971_v41 = vmul.f32 1.442695, %v914_v21 }
 0x2bb   :  { %v1025_v63 = vsub.f32 1.0, %v1551_v5  ;;  %v706_v14 = vpop.xlane.xlu2 %705  ;;  %v700_v2 = vpop.xlane.xlu0 %699 }
 0x2bc   :  { %v1553_v12 = vpop.eup %1552  ;;  %1554 = vpow2.f32 %v971_v41 }
 0x2bd   :  { %v1063_v62 = vmul.f32 %v1025_v63, %v1025_v63  ;;  %v784_v29 = vmul.f32 0.6931472, %v1553_v12  ;;  %1556 = vlog2.f32 %v2479_v15 }
 0x2be   :  { %1558 = vlog2.f32 %v697_v4 }
 0x2bf   :  { %v1101_v16 = vmul.f32 %v1063_v62, %v873_v57  ;;  %v2497_v54 = vpop.xlane.xlu1 %720  ;;  %1560 = vlog2.f32 %v700_v2 }
 0x2c0   :  { %1562 = vlog2.f32 %v2483_v48 }
 0x2c1   :  { %v1311_v43 = vsel %vm1279_vm1, %v1101_v16, 0.0 }
 0x2c2   :  { %v1312_v50 = vadd.f32 %v1311_v43, %v2320_v56  ;;  %v1555_v52 = vpop.eup %1554 }
 0x2c3   :  { %v507_v6 = vpop.xlane.xlu2 %506  ;;  %v501_v40 = vpop.xlane.xlu0 %500  ;;  %v1028_v3 = vsub.f32 1.0, %v1555_v52 }
 0x2c4   :  { %v1314_v59 = vadd.f32 %v1313_v19, %v1312_v50  ;;  %v839_v32 = vsub.f32 %v784_v29, %v501_v40  ;;  %v1557_v56 = vpop.eup %1556 }
 0x2c5   :  { %v786_v38 = vmul.f32 0.6931472, %v1557_v56  ;;  %v1066_v30 = vmul.f32 %v1028_v3, %v1028_v3  ;;  %v1559_v55 = vpop.eup %1558 }
 0x2c6   :  { %v1316_v22 = vadd.f32 %v1315_v31, %v1314_v59  ;;  %v877_v60 = vmax.f32 %v839_v32, 0.0  ;;  %v1561_v58 = vpop.eup %1560  ;;  %v788_v51 = vmul.f32 0.6931472, %v1559_v55 }
 0x2c7   :  { %v2502_v28 = vpop.xlane.xlu1 %521  ;;  %v840_v15 = vsub.f32 %v786_v38, %v2487_v33  ;;  %v1563_v24 = vpop.eup %1562  ;;  %v1104_v9 = vmul.f32 %v1066_v30, %v876_v44  ;;  %v790_v35 = vmul.f32 0.6931472, %v1561_v58 }
 0x2c8   :  { %v915_v61 = vsub.f32 0.0, %v877_v60  ;;  %v792_v57 = vmul.f32 0.6931472, %v1563_v24  ;;  %v841_v47 = vsub.f32 %v788_v51, %v507_v6 }
 0x2c9   :  { %v2505_v25 = vmax.f32 %v840_v15, 0.0  ;;  %v1317_v36 = vsel %vm1279_vm1, %v1104_v9, 0.0 }
 0x2ca   :  { %v973_v11 = vmul.f32 1.442695, %v915_v61  ;;  %v843_v33 = vsub.f32 %v792_v57, %v2492_v23  ;;  %v1318_v20 = vadd.f32 %v1317_v36, %v1316_v22  ;;  %v2510_v18 = vmax.f32 %v841_v47, 0.0 }
 0x2cb   :  { %v715_v8 = vpop.xlane.xlu2 %714  ;;  %v709_v17 = vpop.xlane.xlu0 %708  ;;  %v916_v7 = vsub.f32 0.0, %v2505_v25 }
 0x2cc   :  { %1564 = vpow2.f32 %v973_v11  ;;  %v2516_v21 = vmax.f32 %v843_v33, 0.0  ;;  %v917_v2 = vsub.f32 0.0, %v2510_v18 }
 0x2cd   :  { %1566 = vlog2.f32 %v706_v14  ;;  %v975_v63 = vmul.f32 1.442695, %v916_v7 }
 0x2ce   :  { %1568 = vlog2.f32 %v709_v17  ;;  %v919_v41 = vsub.f32 0.0, %v2516_v21  ;;  %v977_v46 = vmul.f32 1.442695, %v917_v2 }
 0x2cf   :  { %v730_v53 = vpop.xlane.xlu1 %729  ;;  %1570 = vlog2.f32 %v2490_v1 }
 0x2d0   :  { %1572 = vlog2.f32 %v715_v8  ;;  %v981_v50 = vmul.f32 1.442695, %v919_v41 }
 0x2d1   :  { %1574 = vpow2.f32 %v975_v63 }
 0x2d2   :  { %v1565_v0 = vpop.eup %1564  ;;  %1576 = vlog2.f32 %v2497_v54 }
 0x2d3   :  { %v516_v26 = vpop.xlane.xlu2 %515  ;;  %v510_v42 = vpop.xlane.xlu0 %509  ;;  %v1029_v48 = vsub.f32 1.0, %v1565_v0  ;;  %1578 = vpow2.f32 %v977_v46 }
 0x2d4   :  { %v842_v37 = vsub.f32 %v790_v35, %v510_v42  ;;  %v1567_v44 = vpop.eup %1566 }
 0x2d5   :  { %v1067_v13 = vmul.f32 %v1029_v48, %v1029_v48  ;;  %v794_v14 = vmul.f32 0.6931472, %v1567_v44  ;;  %v1569_v62 = vpop.eup %1568 }
 0x2d6   :  { %v2514_v39 = vmax.f32 %v842_v37, 0.0  ;;  %v1571_v12 = vpop.eup %1570  ;;  %v796_v16 = vmul.f32 0.6931472, %v1569_v62 }
 0x2d7   :  { %v1105_v4 = vmul.f32 %v1067_v13, %v877_v60  ;;  %v844_v1 = vsub.f32 %v794_v14, %v516_v26  ;;  %v531_v43 = vpop.xlane.xlu1 %530  ;;  %v798_v29 = vmul.f32 0.6931472, %v1571_v12  ;;  %v1573_v32 = vpop.eup %1572 }
 0x2d8   :  { %v918_v10 = vsub.f32 0.0, %v2514_v39  ;;  %v1575_v22 = vpop.eup %1574  ;;  %v800_v61 = vmul.f32 0.6931472, %v1573_v32 }
 0x2d9   :  { %v1319_v27 = vsel %vm1279_vm1, %v1105_v4, 0.0  ;;  %v2523_v19 = vmax.f32 %v844_v1, 0.0  ;;  %v846_v31 = vsub.f32 %v798_v29, %v2502_v28  ;;  %v1030_v11 = vsub.f32 1.0, %v1575_v22  ;;  %v1577_v54 = vpop.eup %1576 }
 0x2da   :  { %v2518_v5 = vadd.f32 %v1319_v27, %v1318_v20  ;;  %v979_v34 = vmul.f32 1.442695, %v918_v10  ;;  %v1579_v17 = vpop.eup %1578  ;;  %v804_v26 = vmul.f32 0.6931472, %v1577_v54 }
 0x2db   :  { %v724_v23 = vpop.xlane.xlu2 %723  ;;  %v718_v45 = vpop.xlane.xlu0 %717  ;;  %v920_v52 = vsub.f32 0.0, %v2523_v19  ;;  %v2531_v56 = vmax.f32 %v846_v31, 0.0  ;;  %v1068_v9 = vmul.f32 %v1030_v11, %v1030_v11  ;;  %v1031_v48 = vsub.f32 1.0, %v1579_v17 }
 0x2dc   :  { %1580 = vpow2.f32 %v979_v34  ;;  %v849_v47 = vsub.f32 %v804_v26, %v531_v43 }
 0x2dd   :  { %1582 = vpow2.f32 %v981_v50  ;;  %v983_v38 = vmul.f32 1.442695, %v920_v52  ;;  %v922_v0 = vsub.f32 0.0, %v2531_v56  ;;  %v1106_v36 = vmul.f32 %v1068_v9, %v2505_v25 }
 0x2de   :  { %1584 = vlog2.f32 %v724_v23  ;;  %v1069_v20 = vmul.f32 %v1031_v48, %v1031_v48 }
 0x2df   :  { %1586 = vlog2.f32 %v718_v45  ;;  %v739_v15 = vpop.xlane.xlu1 %738  ;;  %v987_v13 = vmul.f32 1.442695, %v922_v0  ;;  %v2540_v45 = vmax.f32 %v849_v47, 0.0  ;;  %v1321_v62 = vsel %vm1279_vm1, %v1106_v36, 0.0 }
 0x2e0   :  { %1588 = vlog2.f32 %v730_v53  ;;  %v1107_v12 = vmul.f32 %v1069_v20, %v2510_v18  ;;  %v1322_v43 = vadd.f32 %v1321_v62, %v2518_v5 }
 0x2e1   :  { %1590 = vpow2.f32 %v983_v38  ;;  %v925_v29 = vsub.f32 0.0, %v2540_v45 }
 0x2e2   :  { %v1581_v55 = vpop.eup %1580  ;;  %v1323_v18 = vsel %vm1279_vm1, %v1107_v12, 0.0 }
 0x2e3   :  { %v525_v6 = vpop.xlane.xlu2 %524  ;;  %v519_v40 = vpop.xlane.xlu0 %518  ;;  %v1032_v57 = vsub.f32 1.0, %v1581_v55  ;;  %v993_v11 = vmul.f32 1.442695, %v925_v29 }
 0x2e4   :  { %v845_v59 = vsub.f32 %v796_v16, %v519_v40  ;;  %v847_v8 = vsub.f32 %v800_v61, %v525_v6  ;;  %v1583_v24 = vpop.eup %1582 }
 0x2e5   :  { %v1585_v51 = vpop.eup %1584  ;;  %v1033_v37 = vsub.f32 1.0, %v1583_v24  ;;  %v1070_v44 = vmul.f32 %v1032_v57, %v1032_v57 }
 0x2e6   :  { %v2527_v60 = vmax.f32 %v845_v59, 0.0  ;;  %v2536_v42 = vmax.f32 %v847_v8, 0.0  ;;  %v1587_v35 = vpop.eup %1586  ;;  %v806_v33 = vmul.f32 0.6931472, %v1585_v51 }
 0x2e7   :  { %v802_v7 = vmul.f32 0.6931472, %v1587_v35  ;;  %v1589_v23 = vpop.eup %1588  ;;  %v1071_v25 = vmul.f32 %v1033_v37, %v1033_v37  ;;  %v540_v1 = vpop.xlane.xlu1 %539  ;;  %v1108_v16 = vmul.f32 %v1070_v44, %v2514_v39 }
 0x2e8   :  { %v921_v3 = vsub.f32 0.0, %v2527_v60  ;;  %v923_v4 = vsub.f32 0.0, %v2536_v42  ;;  %v1591_v2 = vpop.eup %1590  ;;  %v810_v46 = vmul.f32 0.6931472, %v1589_v23 }
 0x2e9   :  { %v1034_v6 = vsub.f32 1.0, %v1591_v2  ;;  %v1325_v39 = vsel %vm1279_vm1, %v1108_v16, 0.0  ;;  %v1109_v61 = vmul.f32 %v1071_v25, %v2516_v21 }
 0x2ea   :  { %v985_v58 = vmul.f32 1.442695, %v921_v3  ;;  %v989_v41 = vmul.f32 1.442695, %v923_v4  ;;  %v852_v32 = vsub.f32 %v810_v46, %v540_v1  ;;  %v1324_v3 = vadd.f32 %v1323_v18, %v1322_v43 }
 0x2eb   :  { %v2533_v30 = vpop.xlane.xlu2 %732  ;;  %v727_v28 = vpop.xlane.xlu0 %726  ;;  %v1072_v8 = vmul.f32 %v1034_v6, %v1034_v6  ;;  %v1327_v9 = vsel %vm1279_vm1, %v1109_v61, 0.0 }
 0x2ec   :  { %1592 = vpow2.f32 %v985_v58  ;;  %v2556_v55 = vmax.f32 %v852_v32, 0.0 }
 0x2ed   :  { %1594 = vpow2.f32 %v987_v13  ;;  %v1110_v51 = vmul.f32 %v1072_v8, %v2523_v19 }
 0x2ee   :  { %1596 = vlog2.f32 %v739_v15  ;;  %v928_v57 = vsub.f32 0.0, %v2556_v55 }
 0x2ef   :  { %1598 = vlog2.f32 %v727_v28  ;;  %v1326_v28 = vadd.f32 %v1325_v39, %v1324_v3  ;;  %v549_v0 = vpop.xlane.xlu1 %548  ;;  %v1329_v19 = vsel %vm1279_vm1, %v1110_v51, 0.0 }
 0x2f0   :  { %1600 = vpow2.f32 %v989_v41  ;;  %v999_v23 = vmul.f32 1.442695, %v928_v57 }
 0x2f1   :  { %v1328_v48 = vadd.f32 %v1327_v9, %v1326_v28 }
 0x2f2   :  { %v1593_v10 = vpop.eup %1592 }
 0x2f3   :  { %v534_v27 = vpop.xlane.xlu2 %533  ;;  %v528_v53 = vpop.xlane.xlu0 %527  ;;  %v1035_v40 = vsub.f32 1.0, %v1593_v10 }
 0x2f4   :  { %v850_v63 = vsub.f32 %v806_v33, %v534_v27  ;;  %v848_v14 = vsub.f32 %v802_v7, %v528_v53  ;;  %v1595_v5 = vpop.eup %1594 }
 0x2f5   :  { %v1073_v17 = vmul.f32 %v1035_v40, %v1035_v40  ;;  %v1597_v38 = vpop.eup %1596  ;;  %v1036_v58 = vsub.f32 1.0, %v1595_v5 }
 0x2f6   :  { %v2545_v34 = vmax.f32 %v848_v14, 0.0  ;;  %v2549_v50 = vmax.f32 %v850_v63, 0.0  ;;  %v1599_v15 = vpop.eup %1598  ;;  %v816_v26 = vmul.f32 0.6931472, %v1597_v38 }
 0x2f7   :  { %v1601_v24 = vpop.eup %1600  ;;  %v1111_v35 = vmul.f32 %v1073_v17, %v2527_v60  ;;  %v808_v47 = vmul.f32 0.6931472, %v1599_v15  ;;  %v1074_v13 = vmul.f32 %v1036_v58, %v1036_v58 }
 0x2f8   :  { %v924_v59 = vsub.f32 0.0, %v2545_v34  ;;  %v926_v54 = vsub.f32 0.0, %v2549_v50  ;;  %v1037_v37 = vsub.f32 1.0, %v1601_v24  ;;  %v855_v33 = vsub.f32 %v816_v26, %v549_v0 }
 0x2f9   :  { %v1331_v27 = vsel %vm1279_vm1, %v1111_v35, 0.0  ;;  %v1112_v10 = vmul.f32 %v1074_v13, %v2531_v56 }
 0x2fa   :  { %v991_v31 = vmul.f32 1.442695, %v924_v59  ;;  %v995_v21 = vmul.f32 1.442695, %v926_v54  ;;  %v1075_v62 = vmul.f32 %v1037_v37, %v1037_v37  ;;  %v2566_v25 = vmax.f32 %v855_v33, 0.0 }
 0x2fb   :  { %v742_v22 = vpop.xlane.xlu2 %741  ;;  %v736_v52 = vpop.xlane.xlu0 %735  ;;  %v1333_v59 = vsel %vm1279_vm1, %v1112_v10, 0.0 }
 0x2fc   :  { %1602 = vpow2.f32 %v991_v31  ;;  %v1113_v32 = vmul.f32 %v1075_v62, %v2536_v42  ;;  %v931_v56 = vsub.f32 0.0, %v2566_v25 }
 0x2fd   :  { %1604 = vlog2.f32 %v736_v52 }
 0x2fe   :  { %1606 = vpow2.f32 %v993_v11  ;;  %v1335_v8 = vsel %vm1279_vm1, %v1113_v32, 0.0  ;;  %v1005_v17 = vmul.f32 1.442695, %v931_v56 }
 0x2ff   :  { %1608 = vlog2.f32 %v2533_v30  ;;  %v1330_v30 = vadd.f32 %v1329_v19, %v1328_v48 }
 0x300   :  { %1610 = vpow2.f32 %v995_v21 }
 0x301   :  { %v1332_v1 = vadd.f32 %v1331_v27, %v1330_v30  ;;  %1612 = vlog2.f32 %v742_v22 }
 0x302   :  { %v1603_v36 = vpop.eup %1602  ;;  %1614 = vpow2.f32 %v999_v23 }
 0x303   :  { %v537_v7 = vpop.xlane.xlu0 %536  ;;  %v1038_v4 = vsub.f32 1.0, %v1603_v36  ;;  %v1605_v44 = vpop.eup %1604  ;;  %v1334_v31 = vadd.f32 %v1333_v59, %v1332_v1 }
 0x304   :  { %v851_v20 = vsub.f32 %v808_v47, %v537_v7  ;;  %v546_v60 = vpop.xlane.xlu2 %545  ;;  %v1607_v53 = vpop.eup %1606  ;;  %v814_v63 = vmul.f32 0.6931472, %v1605_v44 }
 0x305   :  { %v1609_v2 = vpop.eup %1608  ;;  %v1076_v41 = vmul.f32 %v1038_v4, %v1038_v4  ;;  %v1039_v16 = vsub.f32 1.0, %v1607_v53  ;;  %v1336_v28 = vadd.f32 %v1335_v8, %v1334_v31 }
 0x306   :  { %v889_v14 = vmax.f32 %v851_v20, 0.0  ;;  %v854_v12 = vsub.f32 %v814_v63, %v546_v60  ;;  %v1611_v43 = vpop.eup %1610  ;;  %v812_v29 = vmul.f32 0.6931472, %v1609_v2 }
 0x307   :  { %v1114_v18 = vmul.f32 %v1076_v41, %v2545_v34  ;;  %v1077_v61 = vmul.f32 %v1039_v16, %v1039_v16  ;;  %v1040_v22 = vsub.f32 1.0, %v1611_v43  ;;  %v1613_v54 = vpop.eup %1612 }
 0x308   :  { %v927_v46 = vsub.f32 0.0, %v889_v14  ;;  %v892_v6 = vmax.f32 %v854_v12, 0.0  ;;  %v1615_v42 = vpop.eup %1614  ;;  %v818_v0 = vmul.f32 0.6931472, %v1613_v54 }
 0x309   :  { %v1337_v38 = vsel %vm1279_vm1, %v1114_v18, 0.0  ;;  %v1115_v34 = vmul.f32 %v1077_v61, %v2540_v45  ;;  %v1078_v58 = vmul.f32 %v1040_v22, %v1040_v22  ;;  %v1042_v51 = vsub.f32 1.0, %v1615_v42 }
 0x30a   :  { %v997_v40 = vmul.f32 1.442695, %v927_v46  ;;  %v930_v52 = vsub.f32 0.0, %v892_v6  ;;  %v1338_v9 = vadd.f32 %v1337_v38, %v1336_v28  ;;  %v1671_v22 = vmov 0.0  }
 0x30b   :  { %v543_v39 = vpop.xlane.xlu0 %542  ;;  %v1339_v57 = vsel %vm1279_vm1, %v1115_v34, 0.0  ;;  %v1116_v47 = vmul.f32 %v1078_v58, %v2549_v50  ;;  %v1080_v45 = vmul.f32 %v1042_v51, %v1042_v51  ;;  %17 = vst.msk [vmem:[#allocation2] sm:$0x1] %vm16_vm11, %v1671_v22 }
 0x30c   :  { %1616 = vpow2.f32 %v997_v40  ;;  %v853_v5 = vsub.f32 %v812_v29, %v543_v39  ;;  %v1003_v3 = vmul.f32 1.442695, %v930_v52  ;;  %v1340_v37 = vadd.f32 %v1339_v57, %v1338_v9 }
 0x30d   :  { %v1341_v19 = vsel %vm1279_vm1, %v1116_v47, 0.0  ;;  %v1118_v23 = vmul.f32 %v1080_v45, %v2556_v55 }
 0x30e   :  { %v891_v11 = vmax.f32 %v853_v5, 0.0  ;;  %1618 = vpow2.f32 %v1003_v3  ;;  %v1342_v53 = vadd.f32 %v1341_v19, %v1340_v37 }
 0x30f   :  { %1620 = vpow2.f32 %v1005_v17  ;;  %v1345_v41 = vsel %vm1279_vm1, %v1118_v23, 0.0 }
 0x310   :  { %v929_v15 = vsub.f32 0.0, %v891_v11 }
 0x312   :  { %v1617_v24 = vpop.eup %1616  ;;  %v1001_v21 = vmul.f32 1.442695, %v929_v15  ;;  %v1278_v42 = vld [vmem:[#allocation2] sm:$0x1] }
 0x313   :  { %v1041_v26 = vsub.f32 1.0, %v1617_v24  ;;  %v552_v35 = vpop.xlane.xlu0 %551 }
 0x314   :  { %1622 = vpow2.f32 %v1001_v21  ;;  %v856_v48 = vsub.f32 %v818_v0, %v552_v35  ;;  %v1619_v13 = vpop.eup %1618 }
 0x315   :  { %v1079_v36 = vmul.f32 %v1041_v26, %v1041_v26  ;;  %v1044_v4 = vsub.f32 1.0, %v1619_v13  ;;  %v1621_v44 = vpop.eup %1620 }
 0x316   :  { %v894_v33 = vmax.f32 %v856_v48, 0.0  ;;  %v1045_v50 = vsub.f32 1.0, %v1621_v44 }
 0x317   :  { %v1117_v7 = vmul.f32 %v1079_v36, %v889_v14  ;;  %v1082_v2 = vmul.f32 %v1044_v4, %v1044_v4  ;;  %v1125_v14 = vshrl.u32 %v247_v49, 7 }
 0x318   :  { %v932_v20 = vsub.f32 0.0, %v894_v33  ;;  %v1083_v12 = vmul.f32 %v1045_v50, %v1045_v50 }
 0x319   :  { %v1343_v27 = vsel %vm1279_vm1, %v1117_v7, 0.0  ;;  %v1120_v46 = vmul.f32 %v1082_v2, %v892_v6  ;;  %v1162_v59 = vadd.s32 296, %v1125_v14 }
 0x31a   :  { %v1623_v60 = vpop.eup %1622  ;;  %v1007_v30 = vmul.f32 1.442695, %v932_v20  ;;  %v1344_v10 = vadd.f32 %v1343_v27, %v1342_v53  ;;  %v1121_v32 = vmul.f32 %v1083_v12, %v2566_v25 }
 0x31b   :  { %v1043_v63 = vsub.f32 1.0, %v1623_v60  ;;  %v1349_v56 = vsel %vm1279_vm1, %v1120_v46, 0.0  ;;  %vm1239_vm0 = vcmp.lt.s32.totalorder %v1162_v59, 300 }
 0x31c   :  { %1624 = vpow2.f32 %v1007_v30  ;;  %v1346_v16 = vadd.f32 %v1345_v41, %v1344_v10  ;;  %v1351_v31 = vsel %vm1279_vm1, %v1121_v32, 0.0 }
 0x31d   :  { %v1081_v62 = vmul.f32 %v1043_v63, %v1043_v63 }
 0x31f   :  { %v1119_v1 = vmul.f32 %v1081_v62, %v891_v11 }
 0x321   :  { %v1347_v43 = vsel %vm1279_vm1, %v1119_v1, 0.0 }
 0x322   :  { %v1625_v29 = vpop.eup %1624  ;;  %v1348_v40 = vadd.f32 %v1347_v43, %v1346_v16 }
 0x323   :  { %v1046_v55 = vsub.f32 1.0, %v1625_v29 }
 0x324   :  { %v1350_v39 = vadd.f32 %v1349_v56, %v1348_v40 }
 0x325   :  { %v1084_v18 = vmul.f32 %v1046_v55, %v1046_v55 }
 0x326   :  { %v1352_v5 = vadd.f32 %v1351_v31, %v1350_v39 }
 0x327   :  { %v1122_v49 = vmul.f32 %v1084_v18, %v894_v33 }
 0x329   :  { %v1277_v52 = vsel %vm1239_vm0, %v1122_v49, 0.0 }
 0x32a   :  { %v1353_v6 = vsel %vm1279_vm1, %v1277_v52, 0.0 }
 0x32b   :  { %v1354_v61 = vadd.f32 %v1353_v6, %v1352_v5 }
 0x32d   :  { %1355 = vadd.xlane.f32.xlu2 %v1354_v61 }
 0x3a0   :  { %v1356_v3 = vpop.xlane.xlu2 %1355 }
 0x3a1   :  { %v1357_v25 = vrot.slane %v1356_v3, 4 }
 0x3a3   :  { %v1358_v11 = vadd.f32 %v1357_v25, %v1356_v3 }
 0x3a5   :  { %v1359_v54 = vrot.slane %v1358_v11, 2 }
 0x3a7   :  { %v1360_v8 = vadd.f32 %v1359_v54, %v1358_v11 }
 0x3a9   :  { %v1361_v17 = vrot.slane %v1360_v8, 1 }
 0x3ab   :  { %v1362_v38 = vadd.f32 %v1361_v17, %v1360_v8 }
 0x3ad   :  { %1390 = vpush %v1362_v38 }
 0x3de   :  { %s1391_s0 = spop %1390 }
 0x3df   :  { %v1364_v28 = vstv %s1391_s0 }
 0x3e0   :  { %v1365_v15 = vadd.f32 %v1364_v28, %v1278_v42 }
 0x3e2   :  { %1367 = vst.msk [vmem:[#allocation2] sm:$0x1] %vm16_vm11, %v1365_v15 }
 0x3e9   :  { %v1371_v34 = vld [vmem:[#allocation2] sm:$0x1] }
 0x3ea   :  { %v1372_v58 = vmul.f32 0.0033333334, %v1371_v34 }
 0x3ec   :  { %1373 = vst.msk [vmem:[#allocation3] sm:$0x1] %vm16_vm11, %v1372_v58 }
 0x3ed   :  { %1384 = dma.vmem_to_hbm [thread:$0]  %s1380_s28, 16, %s1382_s3, [#allocation4]  }
 0x3ee   :  { %1668 = dma.done.wait [#allocation4], 16  }
 0x3ef   :  { %1669 = vsyncadd [#allocation4], 4294967280 }
 0x3f0   :  { %1389 = vsyncpa [#allocation4], 1 }

</bundles_post_ra>
